<compile_context>
chip_gen: v5e
topology: v5e:2x2
jax: 0.10.0
libtpu: 0.0.40
codegen_flags: <defaults>
</compile_context>

<pallas_src>
import jax
import jax.numpy as jnp
from jax import lax
from jax.experimental import pallas as pl
from jax.experimental.pallas import tpu as pltpu


# ----------------------------- LSTM kernel ---------------------------------
def lstm_seq_kernel(gx_ref, whh_ref, out_ref):
    # gx_ref : (S, B, 4H) f32  -- precomputed x @ W_ih + b, gates as [i|f|o|g]
    # whh_ref: (H, 4H)   bf16
    # out_ref: (S, B, H) f32
    S, B, H4 = gx_ref.shape
    H = H4 // 4
    whh = whh_ref[...]  # resident in VMEM for the whole recurrence

    def step(t, carry):
        h, c = carry
        gates = gx_ref[t] + jnp.dot(h.astype(jnp.bfloat16), whh,
                                    preferred_element_type=jnp.float32)
        sig = jax.nn.sigmoid(gates[:, :3 * H])   # [i | f | o] in one contiguous slice
        g = jnp.tanh(gates[:, 3 * H:])
        i = sig[:, :H]
        f = sig[:, H:2 * H]
        o = sig[:, 2 * H:3 * H]
        c_new = f * c + i * g
        h_new = o * jnp.tanh(c_new)
        out_ref[t] = h_new
        return (h_new, c_new)

    init = (jnp.zeros((B, H), jnp.float32), jnp.zeros((B, H), jnp.float32))
    lax.fori_loop(0, S, step, init, unroll=bool(S <= 16))


def lstm_pallas(gates_x, w_hh_bf16):
    # TODO(synk): for very long sequences / large batches, chunk the time axis
    # (grid over S-chunks) so the gates block stays inside VMEM (v7x: 64 MiB).
    S, B, H4 = gates_x.shape
    H = H4 // 4
    return pl.pallas_call(
        lstm_seq_kernel,
        out_shape=jax.ShapeDtypeStruct((S, B, H), jnp.float32),
        grid_spec=pltpu.PrefetchScalarGridSpec(
            num_scalar_prefetch=0,
            grid=(1,),
            in_specs=[
                pl.BlockSpec((S, B, H4), lambda i: (0, 0, 0)),
                pl.BlockSpec((H, H4), lambda i: (0, 0)),
            ],
            out_specs=pl.BlockSpec((S, B, H), lambda i: (0, 0, 0)),
        ),
        compiler_params=pltpu.CompilerParams(dimension_semantics=("arbitrary",)),
    )(gates_x, w_hh_bf16)


# --------------------------- Attention kernel -------------------------------
def attn_kernel(lstm_ref, wa_ref, ba_ref, alpha_ref, sqa_ref):
    # lstm_ref : (1, S, H) f32   masked LSTM output for this batch element
    # wa_ref   : (H, 4H)   bf16  all 4 aspect alpha-weights, concatenated
    # ba_ref   : (4, 1, 1) f32   alpha biases
    # alpha_ref: (1, 2, S, S) f32  only alpha1/alpha2 are consumed downstream
    # sqa_ref  : (1, 1, 1) f32   per-batch sum((A^T A - I)^2)
    L32 = lstm_ref[0]                                   # (S, H) f32
    S, H = L32.shape
    L = L32.astype(jnp.bfloat16)
    LT = jnp.transpose(L32).astype(jnp.bfloat16)        # (H, S): one transpose / batch
    wa = wa_ref[...]
    ball = ba_ref[...]                                  # (4, 1, 1)

    # One wide MXU matmul covering all 4 aspects.
    LW_all = jnp.dot(L, wa, preferred_element_type=jnp.float32)   # (S, 4H) f32

    rows = lax.broadcasted_iota(jnp.int32, (S, S), 0)
    cols = lax.broadcasted_iota(jnp.int32, (S, S), 1)
    ident = (rows == cols).astype(jnp.float32)

    gram = jnp.zeros((S, S), jnp.float32)
    for a in range(4):                                  # static, unrolled
        lw_a = LW_all[:, a * H:(a + 1) * H].astype(jnp.bfloat16)
        scores = jnp.tanh(jnp.dot(lw_a, LT, preferred_element_type=jnp.float32)
                          + ball[a])
        alpha = jax.nn.softmax(scores, axis=0)          # torch softmax dim=1 (row axis)
        if a < 2:
            alpha_ref[0, a] = alpha
        # A^T A accumulation over the 4 aspects (cat along dim=1 in torch).
        gram = gram + lax.dot_general(alpha, alpha, (((0,), (0,)), ((), ())),
                                      preferred_element_type=jnp.float32)

    d = gram - ident
    sqa_ref[...] = jnp.zeros((1, 1, 1), jnp.float32) + jnp.sum(d * d)


def attention_pallas(lstmout, wa_all_bf16, b_alpha):
    B, S, H = lstmout.shape
    out_shapes = (
        jax.ShapeDtypeStruct((B, 2, S, S), jnp.float32),  # alpha1, alpha2
        jax.ShapeDtypeStruct((B, 1, 1), jnp.float32),     # per-batch ||A^T A - I||_F^2
    )
    return pl.pallas_call(
        attn_kernel,
        out_shape=out_shapes,
        grid_spec=pltpu.PrefetchScalarGridSpec(
            num_scalar_prefetch=0,
            grid=(B,),
            in_specs=[
                pl.BlockSpec((1, S, H), lambda b: (b, 0, 0)),
                pl.BlockSpec((H, 4 * H), lambda b: (0, 0)),
                pl.BlockSpec((4, 1, 1), lambda b: (0, 0, 0)),
            ],
            out_specs=[
                pl.BlockSpec((1, 2, S, S), lambda b: (b, 0, 0, 0)),
                pl.BlockSpec((1, 1, 1), lambda b: (b, 0, 0)),
            ],
        ),
        compiler_params=pltpu.CompilerParams(dimension_semantics=("parallel",)),
    )(lstmout, wa_all_bf16, b_alpha)


# ------------------------------ Parameters ----------------------------------
def init_params(key, vocab_size, embed_dim, hidden_dim, polarities_dim, max_seq_len):
    E, H, P = embed_dim, hidden_dim, polarities_dim
    keys = jax.random.split(key, 13)
    s = 1.0 / float(jnp.sqrt(jnp.float32(H)))
    params = dict(
        embed=jax.random.normal(keys[0], (vocab_size + 2, E)) * 0.5,
        pos_embed=jax.random.normal(keys[1], (max_seq_len + 1, E)) * 0.5,
        w_ih=jax.random.uniform(keys[2], (2 * E, 4 * H), minval=-s, maxval=s),
        w_hh=jax.random.uniform(keys[3], (H, 4 * H), minval=-s, maxval=s),
        b_lstm=jax.random.uniform(keys[4], (1, 4 * H), minval=-s, maxval=s),
        w_alpha=jax.random.normal(keys[5], (4, H, H)) * 0.1,
        b_alpha=jax.random.normal(keys[6], (4, 1, 1)) * 0.1,
        w_gamma=jax.random.normal(keys[7], (4, H, H)) * 0.1,
        b_gamma=jax.random.normal(keys[8], (4, 1, 1)) * 0.1,
        dense_w=jax.random.normal(keys[9], (4, P, H)) * 0.1,
        dense_b=jax.random.normal(keys[10], (4, P)) * 0.1,
        dense_all_w=jax.random.normal(keys[11], (P, 4 * H)) * 0.1,
        dense_all_b=jax.random.normal(keys[12], (P,)) * 0.1,
    )
    # index 0 is padding in both tables (embedding_matrix[0]=0, padding_idx=0)
    params["embed"] = params["embed"].at[0].set(0.0)
    params["pos_embed"] = params["pos_embed"].at[0].set(0.0)
    return params


# ------------------------------- Forward ------------------------------------
def man_forward(params, review_indices, words_pos):
    B, S = review_indices.shape
    H = params["w_hh"].shape[0]

    text_emb = params["embed"][review_indices]        # (B, S, E)
    position_emb = params["pos_embed"][words_pos]     # (B, S, E)
    text_len = jnp.sum(review_indices != 0, axis=-1)  # (B,)
    text_pos = jnp.concatenate([position_emb, text_emb], axis=-1).astype(jnp.float32)

    # ---- LSTM: reorder gates [i|f|g|o] -> [i|f|o|g], hoist input projection ----
    def reorder_gates(w):
        return jnp.concatenate([w[..., :2 * H], w[..., 3 * H:4 * H],
                                w[..., 2 * H:3 * H]], axis=-1)

    w_ih_r = reorder_gates(params["w_ih"])
    w_hh_r = reorder_gates(params["w_hh"]).astype(jnp.bfloat16)
    b_r = reorder_gates(params["b_lstm"])

    gates_x = jnp.einsum("bsi,ig->sbg", text_pos, w_ih_r) + b_r[0]   # (S, B, 4H)
    lstm_t = lstm_pallas(gates_x, w_hh_r)                            # (S, B, H)
    lstmout = jnp.transpose(lstm_t, (1, 0, 2))                       # (B, S, H)

    # packed-sequence semantics: zeros past each sequence's length
    valid = (jnp.arange(S)[None, :] < text_len[:, None]).astype(jnp.float32)
    lstmout = lstmout * valid[..., None]

    # ---- attention: all 4 aspects fused per batch element ----
    wa_all = jnp.transpose(params["w_alpha"], (1, 0, 2)).reshape(H, 4 * H)
    alpha12, sqa = attention_pallas(lstmout, wa_all.astype(jnp.bfloat16),
                                    params["b_alpha"])

    # gamma_i = softmax over a size-1 axis == 1, and the alpha softmax (torch
    # dim=1) has unit column sums, so each aspect output is exactly
    # sum_t lstmout[b, t, :] (faithful to the PyTorch module).
    asp = jnp.sum(lstmout, axis=1)                                   # (B, H)

    orth_a_loss = jnp.sqrt(jnp.sum(sqa)) / S
    # gamma Gram matrix is identically 4*ones(S,S):  ||4*J - I||_F over the batch.
    orth_b_loss = jnp.sqrt(jnp.float32(B * (16 * S * (S - 1) + 9 * S))) / S

    ratings = [asp @ params["dense_w"][i].T + params["dense_b"][i] for i in range(4)]
    overall_in = jnp.concatenate([asp, asp, asp, asp], axis=1)       # (B, 4H)
    overall = overall_in @ params["dense_all_w"].T + params["dense_all_b"]

    return (overall, ratings[0], ratings[1], ratings[2], ratings[3],
            orth_a_loss, orth_b_loss, alpha12[:, 0], alpha12[:, 1])


# --------------------------- Pure-JAX reference ------------------------------
def man_reference(params, review_indices, words_pos):
    B, S = review_indices.shape
    H = params["w_hh"].shape[0]
    text_emb = params["embed"][review_indices]
    pos_emb = params["pos_embed"][words_pos]
    text_len = jnp.sum(review_indices != 0, axis=-1)
    x = jnp.concatenate([pos_emb, text_emb], axis=-1)

    def step(carry, xt):
        h, c = carry
        gates = xt @ params["w_ih"] + h @ params["w_hh"] + params["b_lstm"][0]
        i = jax.nn.sigmoid(gates[:, :H])
        f = jax.nn.sigmoid(gates[:, H:2 * H])
        g = jnp.tanh(gates[:, 2 * H:3 * H])
        o = jax.nn.sigmoid(gates[:, 3 * H:])
        c = f * c + i * g
        h = o * jnp.tanh(c)
        return (h, c), h

    h0 = jnp.zeros((B, H), jnp.float32)
    _, hs = lax.scan(step, (h0, h0), jnp.transpose(x, (1, 0, 2)))
    L = jnp.transpose(hs, (1, 0, 2))
    valid = (jnp.arange(S)[None, :] < text_len[:, None]).astype(jnp.float32)
    L = L * valid[..., None]
    Pool = (jnp.sum(L, 1) / text_len.astype(jnp.float32)[:, None])[:, None, :]

    alphas, gammas, asps = [], [], []
    for a in range(4):
        Wa = params["w_alpha"][a]; ba = params["b_alpha"][a, 0, 0]
        Wg = params["w_gamma"][a]; bg = params["b_gamma"][a, 0, 0]
        sc = jnp.tanh(jnp.einsum("bsh,hk,btk->bst", L, Wa, L) + ba)
        alpha = jax.nn.softmax(sc, axis=1)
        aspect = jnp.einsum("bst,bth->bsh", alpha, L)
        gsc = jnp.tanh(jnp.einsum("bsh,hk,btk->bst", Pool, Wg, L) + bg)
        gamma = jax.nn.softmax(gsc, axis=1)
        out = jnp.einsum("bst,bth->bsh", gamma, aspect)[:, 0, :]
        alphas.append(alpha); gammas.append(gamma); asps.append(out)

    oa = jnp.concatenate(alphas, axis=1)
    og = jnp.concatenate(gammas, axis=1)
    oa = jnp.einsum("bks,bkt->bst", oa, oa) - jnp.eye(S, dtype=jnp.float32)
    og = jnp.einsum("bks,bkt->bst", og, og) - jnp.eye(S, dtype=jnp.float32)
    loss_a = jnp.sqrt(jnp.sum(oa ** 2)) / S
    loss_b = jnp.sqrt(jnp.sum(og ** 2)) / S

    ratings = [asps[i] @ params["dense_w"][i].T + params["dense_b"][i] for i in range(4)]
    overall = (jnp.concatenate(asps, axis=1) @ params["dense_all_w"].T
               + params["dense_all_b"])
    return (overall, ratings[0], ratings[1], ratings[2], ratings[3],
            loss_a, loss_b, alphas[0], alphas[1])


# ---------------------------------- Main -------------------------------------
if __name__ == "__main__":
    import numpy as np

    B, S, E, H, P = 2, 8, 16, 32, 2   # batch, seq, embed, hidden, polarities
    VOCAB = 50

    key = jax.random.PRNGKey(0)
    kp, kx = jax.random.split(key)
    params = init_params(kp, VOCAB, E, H, P, S)

    lens = jnp.array([8, 5], dtype=jnp.int32)
    idx = jax.random.randint(kx, (B, S), 1, VOCAB + 1)
    pos = jnp.tile(jnp.arange(1, S + 1, dtype=jnp.int32)[None, :], (B, 1))
    valid = jnp.arange(S)[None, :] < lens[:, None]
    review_indices = jnp.where(valid, idx, 0)
    words_pos = jnp.where(valid, pos, 0)

    fwd = jax.jit(man_forward)
    outs = jax.block_until_ready(fwd(params, review_indices, words_pos))
    refs = jax.block_until_ready(man_reference(params, review_indices, words_pos))

    names = ["overall_rating", "aspect1_rating", "aspect2_rating",
             "aspect3_rating", "aspect4_rating",
             "orthogonal_a_loss", "orthogonal_b_loss", "alpha1", "alpha2"]
    for n, o, r in zip(names, outs, refs):
        np.testing.assert_allclose(np.asarray(o), np.asarray(r),
                                   rtol=5e-2, atol=5e-2, err_msg=n)

    print("KERNEL_OK")
</pallas_src>

<mosaic_0001>
module attributes {stable_mosaic.version = 11 : i64} {
  func.func @lstm_seq_kernel(%arg0: i32, %arg1: memref<8x2x128xf32, #tpu.memory_space<vmem>>, %arg2: memref<32x128xbf16, #tpu.memory_space<vmem>>, %arg3: memref<8x2x32xf32, #tpu.memory_space<vmem>>) attributes {dimension_semantics = [#tpu.dimension_semantics<arbitrary>], iteration_bounds = array<i64: 1>, scalar_prefetch = 0 : i64, scratch_operands = 0 : i64, tpu.core_type = #tpu.core_type<tc>, window_params = [{pipeline_mode = #tpu.pipeline_mode<synchronous>, transform_indices = @transform_0, window_bounds = array<i64: 8, 2, 128>}, {pipeline_mode = #tpu.pipeline_mode<synchronous>, transform_indices = @transform_1, window_bounds = array<i64: 32, 128>}, {pipeline_mode = #tpu.pipeline_mode<synchronous>, transform_indices = @transform_2, window_bounds = array<i64: 8, 2, 32>}]} {
    %c0 = arith.constant 0 : index
    %c0_0 = arith.constant 0 : index
    %0 = vector.load %arg2[%c0, %c0_0] : memref<32x128xbf16, #tpu.memory_space<vmem>>, vector<32x128xbf16>
    %cst = arith.constant 0.000000e+00 : f32
    %1 = vector.broadcast %cst : f32 to vector<2x32xf32>
    %cst_1 = arith.constant 0.000000e+00 : f32
    %2 = vector.broadcast %cst_1 : f32 to vector<2x32xf32>
    %c0_i32 = arith.constant 0 : i32
    %3 = arith.index_cast %c0_i32 : i32 to index
    %c0_2 = arith.constant 0 : index
    %c0_3 = arith.constant 0 : index
    %4 = vector.load %arg1[%3, %c0_2, %c0_3] : memref<8x2x128xf32, #tpu.memory_space<vmem>>, vector<1x2x128xf32>
    %5 = vector.shape_cast %4 : vector<1x2x128xf32> to vector<2x128xf32>
    %6 = arith.truncf %1 : vector<2x32xf32> to vector<2x32xbf16>
    %cst_4 = arith.constant dense<0.000000e+00> : vector<2x128xf32>
    %7 = tpu.matmul %6, %0, %cst_4 {dimension_numbers = #tpu.dot_dimension_numbers<[1], [0], [0], [1], [0, 0, 1, 1], [], []>} : vector<2x32xbf16>, vector<32x128xbf16>, vector<2x128xf32> -> vector<2x128xf32>
    %8 = arith.addf %5, %7 : vector<2x128xf32>
    %9 = vector.extract_strided_slice %8 {offsets = [0, 0], sizes = [2, 96], strides = [1, 1]} : vector<2x128xf32> to vector<2x96xf32>
    %10 = arith.negf %9 : vector<2x96xf32>
    %11 = math.exp %10 : vector<2x96xf32>
    %cst_5 = arith.constant 1.000000e+00 : f32
    %12 = vector.broadcast %cst_5 : f32 to vector<2x96xf32>
    %13 = arith.addf %12, %11 : vector<2x96xf32>
    %14 = arith.divf %12, %13 : vector<2x96xf32>
    %15 = vector.extract_strided_slice %8 {offsets = [0, 96], sizes = [2, 32], strides = [1, 1]} : vector<2x128xf32> to vector<2x32xf32>
    %16 = math.tanh %15 : vector<2x32xf32>
    %17 = vector.extract_strided_slice %14 {offsets = [0, 0], sizes = [2, 32], strides = [1, 1]} : vector<2x96xf32> to vector<2x32xf32>
    %18 = vector.extract_strided_slice %14 {offsets = [0, 32], sizes = [2, 32], strides = [1, 1]} : vector<2x96xf32> to vector<2x32xf32>
    %19 = vector.extract_strided_slice %14 {offsets = [0, 64], sizes = [2, 32], strides = [1, 1]} : vector<2x96xf32> to vector<2x32xf32>
    %20 = arith.mulf %18, %2 : vector<2x32xf32>
    %21 = arith.mulf %17, %16 : vector<2x32xf32>
    %22 = arith.addf %20, %21 : vector<2x32xf32>
    %23 = math.tanh %22 : vector<2x32xf32>
    %24 = arith.mulf %19, %23 : vector<2x32xf32>
    %25 = arith.index_cast %c0_i32 : i32 to index
    %c0_6 = arith.constant 0 : index
    %c0_7 = arith.constant 0 : index
    %26 = vector.load %arg3[%25, %c0_6, %c0_7] : memref<8x2x32xf32, #tpu.memory_space<vmem>>, vector<1x2x32xf32>
    %27 = vector.shape_cast %26 : vector<1x2x32xf32> to vector<2x32xf32>
    %28 = vector.shape_cast %24 : vector<2x32xf32> to vector<1x2x32xf32>
    tpu.vector_store %arg3[%25, %c0_6, %c0_7], %28 {strides = array<i32>} : memref<8x2x32xf32, #tpu.memory_space<vmem>>, vector<1x2x32xf32>,
    %c1_i32 = arith.constant 1 : i32
    %29 = arith.index_cast %c1_i32 : i32 to index
    %c0_8 = arith.constant 0 : index
    %c0_9 = arith.constant 0 : index
    %30 = vector.load %arg1[%29, %c0_8, %c0_9] : memref<8x2x128xf32, #tpu.memory_space<vmem>>, vector<1x2x128xf32>
    %31 = vector.shape_cast %30 : vector<1x2x128xf32> to vector<2x128xf32>
    %32 = arith.truncf %24 : vector<2x32xf32> to vector<2x32xbf16>
    %cst_10 = arith.constant dense<0.000000e+00> : vector<2x128xf32>
    %33 = tpu.matmul %32, %0, %cst_10 {dimension_numbers = #tpu.dot_dimension_numbers<[1], [0], [0], [1], [0, 0, 1, 1], [], []>} : vector<2x32xbf16>, vector<32x128xbf16>, vector<2x128xf32> -> vector<2x128xf32>
    %34 = arith.addf %31, %33 : vector<2x128xf32>
    %35 = vector.extract_strided_slice %34 {offsets = [0, 0], sizes = [2, 96], strides = [1, 1]} : vector<2x128xf32> to vector<2x96xf32>
    %36 = arith.negf %35 : vector<2x96xf32>
    %37 = math.exp %36 : vector<2x96xf32>
    %cst_11 = arith.constant 1.000000e+00 : f32
    %38 = vector.broadcast %cst_11 : f32 to vector<2x96xf32>
    %39 = arith.addf %38, %37 : vector<2x96xf32>
    %40 = arith.divf %38, %39 : vector<2x96xf32>
    %41 = vector.extract_strided_slice %34 {offsets = [0, 96], sizes = [2, 32], strides = [1, 1]} : vector<2x128xf32> to vector<2x32xf32>
    %42 = math.tanh %41 : vector<2x32xf32>
    %43 = vector.extract_strided_slice %40 {offsets = [0, 0], sizes = [2, 32], strides = [1, 1]} : vector<2x96xf32> to vector<2x32xf32>
    %44 = vector.extract_strided_slice %40 {offsets = [0, 32], sizes = [2, 32], strides = [1, 1]} : vector<2x96xf32> to vector<2x32xf32>
    %45 = vector.extract_strided_slice %40 {offsets = [0, 64], sizes = [2, 32], strides = [1, 1]} : vector<2x96xf32> to vector<2x32xf32>
    %46 = arith.mulf %44, %22 : vector<2x32xf32>
    %47 = arith.mulf %43, %42 : vector<2x32xf32>
    %48 = arith.addf %46, %47 : vector<2x32xf32>
    %49 = math.tanh %48 : vector<2x32xf32>
    %50 = arith.mulf %45, %49 : vector<2x32xf32>
    %51 = arith.index_cast %c1_i32 : i32 to index
    %c0_12 = arith.constant 0 : index
    %c0_13 = arith.constant 0 : index
    %52 = vector.load %arg3[%51, %c0_12, %c0_13] : memref<8x2x32xf32, #tpu.memory_space<vmem>>, vector<1x2x32xf32>
    %53 = vector.shape_cast %52 : vector<1x2x32xf32> to vector<2x32xf32>
    %54 = vector.shape_cast %50 : vector<2x32xf32> to vector<1x2x32xf32>
    tpu.vector_store %arg3[%51, %c0_12, %c0_13], %54 {strides = array<i32>} : memref<8x2x32xf32, #tpu.memory_space<vmem>>, vector<1x2x32xf32>,
    %c2_i32 = arith.constant 2 : i32
    %55 = arith.index_cast %c2_i32 : i32 to index
    %c0_14 = arith.constant 0 : index
    %c0_15 = arith.constant 0 : index
    %56 = vector.load %arg1[%55, %c0_14, %c0_15] : memref<8x2x128xf32, #tpu.memory_space<vmem>>, vector<1x2x128xf32>
    %57 = vector.shape_cast %56 : vector<1x2x128xf32> to vector<2x128xf32>
    %58 = arith.truncf %50 : vector<2x32xf32> to vector<2x32xbf16>
    %cst_16 = arith.constant dense<0.000000e+00> : vector<2x128xf32>
    %59 = tpu.matmul %58, %0, %cst_16 {dimension_numbers = #tpu.dot_dimension_numbers<[1], [0], [0], [1], [0, 0, 1, 1], [], []>} : vector<2x32xbf16>, vector<32x128xbf16>, vector<2x128xf32> -> vector<2x128xf32>
    %60 = arith.addf %57, %59 : vector<2x128xf32>
    %61 = vector.extract_strided_slice %60 {offsets = [0, 0], sizes = [2, 96], strides = [1, 1]} : vector<2x128xf32> to vector<2x96xf32>
    %62 = arith.negf %61 : vector<2x96xf32>
    %63 = math.exp %62 : vector<2x96xf32>
    %cst_17 = arith.constant 1.000000e+00 : f32
    %64 = vector.broadcast %cst_17 : f32 to vector<2x96xf32>
    %65 = arith.addf %64, %63 : vector<2x96xf32>
    %66 = arith.divf %64, %65 : vector<2x96xf32>
    %67 = vector.extract_strided_slice %60 {offsets = [0, 96], sizes = [2, 32], strides = [1, 1]} : vector<2x128xf32> to vector<2x32xf32>
    %68 = math.tanh %67 : vector<2x32xf32>
    %69 = vector.extract_strided_slice %66 {offsets = [0, 0], sizes = [2, 32], strides = [1, 1]} : vector<2x96xf32> to vector<2x32xf32>
    %70 = vector.extract_strided_slice %66 {offsets = [0, 32], sizes = [2, 32], strides = [1, 1]} : vector<2x96xf32> to vector<2x32xf32>
    %71 = vector.extract_strided_slice %66 {offsets = [0, 64], sizes = [2, 32], strides = [1, 1]} : vector<2x96xf32> to vector<2x32xf32>
    %72 = arith.mulf %70, %48 : vector<2x32xf32>
    %73 = arith.mulf %69, %68 : vector<2x32xf32>
    %74 = arith.addf %72, %73 : vector<2x32xf32>
    %75 = math.tanh %74 : vector<2x32xf32>
    %76 = arith.mulf %71, %75 : vector<2x32xf32>
    %77 = arith.index_cast %c2_i32 : i32 to index
    %c0_18 = arith.constant 0 : index
    %c0_19 = arith.constant 0 : index
    %78 = vector.load %arg3[%77, %c0_18, %c0_19] : memref<8x2x32xf32, #tpu.memory_space<vmem>>, vector<1x2x32xf32>
    %79 = vector.shape_cast %78 : vector<1x2x32xf32> to vector<2x32xf32>
    %80 = vector.shape_cast %76 : vector<2x32xf32> to vector<1x2x32xf32>
    tpu.vector_store %arg3[%77, %c0_18, %c0_19], %80 {strides = array<i32>} : memref<8x2x32xf32, #tpu.memory_space<vmem>>, vector<1x2x32xf32>,
    %c3_i32 = arith.constant 3 : i32
    %81 = arith.index_cast %c3_i32 : i32 to index
    %c0_20 = arith.constant 0 : index
    %c0_21 = arith.constant 0 : index
    %82 = vector.load %arg1[%81, %c0_20, %c0_21] : memref<8x2x128xf32, #tpu.memory_space<vmem>>, vector<1x2x128xf32>
    %83 = vector.shape_cast %82 : vector<1x2x128xf32> to vector<2x128xf32>
    %84 = arith.truncf %76 : vector<2x32xf32> to vector<2x32xbf16>
    %cst_22 = arith.constant dense<0.000000e+00> : vector<2x128xf32>
    %85 = tpu.matmul %84, %0, %cst_22 {dimension_numbers = #tpu.dot_dimension_numbers<[1], [0], [0], [1], [0, 0, 1, 1], [], []>} : vector<2x32xbf16>, vector<32x128xbf16>, vector<2x128xf32> -> vector<2x128xf32>
    %86 = arith.addf %83, %85 : vector<2x128xf32>
    %87 = vector.extract_strided_slice %86 {offsets = [0, 0], sizes = [2, 96], strides = [1, 1]} : vector<2x128xf32> to vector<2x96xf32>
    %88 = arith.negf %87 : vector<2x96xf32>
    %89 = math.exp %88 : vector<2x96xf32>
    %cst_23 = arith.constant 1.000000e+00 : f32
    %90 = vector.broadcast %cst_23 : f32 to vector<2x96xf32>
    %91 = arith.addf %90, %89 : vector<2x96xf32>
    %92 = arith.divf %90, %91 : vector<2x96xf32>
    %93 = vector.extract_strided_slice %86 {offsets = [0, 96], sizes = [2, 32], strides = [1, 1]} : vector<2x128xf32> to vector<2x32xf32>
    %94 = math.tanh %93 : vector<2x32xf32>
    %95 = vector.extract_strided_slice %92 {offsets = [0, 0], sizes = [2, 32], strides = [1, 1]} : vector<2x96xf32> to vector<2x32xf32>
    %96 = vector.extract_strided_slice %92 {offsets = [0, 32], sizes = [2, 32], strides = [1, 1]} : vector<2x96xf32> to vector<2x32xf32>
    %97 = vector.extract_strided_slice %92 {offsets = [0, 64], sizes = [2, 32], strides = [1, 1]} : vector<2x96xf32> to vector<2x32xf32>
    %98 = arith.mulf %96, %74 : vector<2x32xf32>
    %99 = arith.mulf %95, %94 : vector<2x32xf32>
    %100 = arith.addf %98, %99 : vector<2x32xf32>
    %101 = math.tanh %100 : vector<2x32xf32>
    %102 = arith.mulf %97, %101 : vector<2x32xf32>
    %103 = arith.index_cast %c3_i32 : i32 to index
    %c0_24 = arith.constant 0 : index
    %c0_25 = arith.constant 0 : index
    %104 = vector.load %arg3[%103, %c0_24, %c0_25] : memref<8x2x32xf32, #tpu.memory_space<vmem>>, vector<1x2x32xf32>
    %105 = vector.shape_cast %104 : vector<1x2x32xf32> to vector<2x32xf32>
    %106 = vector.shape_cast %102 : vector<2x32xf32> to vector<1x2x32xf32>
    tpu.vector_store %arg3[%103, %c0_24, %c0_25], %106 {strides = array<i32>} : memref<8x2x32xf32, #tpu.memory_space<vmem>>, vector<1x2x32xf32>,
    %c4_i32 = arith.constant 4 : i32
    %107 = arith.index_cast %c4_i32 : i32 to index
    %c0_26 = arith.constant 0 : index
    %c0_27 = arith.constant 0 : index
    %108 = vector.load %arg1[%107, %c0_26, %c0_27] : memref<8x2x128xf32, #tpu.memory_space<vmem>>, vector<1x2x128xf32>
    %109 = vector.shape_cast %108 : vector<1x2x128xf32> to vector<2x128xf32>
    %110 = arith.truncf %102 : vector<2x32xf32> to vector<2x32xbf16>
    %cst_28 = arith.constant dense<0.000000e+00> : vector<2x128xf32>
    %111 = tpu.matmul %110, %0, %cst_28 {dimension_numbers = #tpu.dot_dimension_numbers<[1], [0], [0], [1], [0, 0, 1, 1], [], []>} : vector<2x32xbf16>, vector<32x128xbf16>, vector<2x128xf32> -> vector<2x128xf32>
    %112 = arith.addf %109, %111 : vector<2x128xf32>
    %113 = vector.extract_strided_slice %112 {offsets = [0, 0], sizes = [2, 96], strides = [1, 1]} : vector<2x128xf32> to vector<2x96xf32>
    %114 = arith.negf %113 : vector<2x96xf32>
    %115 = math.exp %114 : vector<2x96xf32>
    %cst_29 = arith.constant 1.000000e+00 : f32
    %116 = vector.broadcast %cst_29 : f32 to vector<2x96xf32>
    %117 = arith.addf %116, %115 : vector<2x96xf32>
    %118 = arith.divf %116, %117 : vector<2x96xf32>
    %119 = vector.extract_strided_slice %112 {offsets = [0, 96], sizes = [2, 32], strides = [1, 1]} : vector<2x128xf32> to vector<2x32xf32>
    %120 = math.tanh %119 : vector<2x32xf32>
    %121 = vector.extract_strided_slice %118 {offsets = [0, 0], sizes = [2, 32], strides = [1, 1]} : vector<2x96xf32> to vector<2x32xf32>
    %122 = vector.extract_strided_slice %118 {offsets = [0, 32], sizes = [2, 32], strides = [1, 1]} : vector<2x96xf32> to vector<2x32xf32>
    %123 = vector.extract_strided_slice %118 {offsets = [0, 64], sizes = [2, 32], strides = [1, 1]} : vector<2x96xf32> to vector<2x32xf32>
    %124 = arith.mulf %122, %100 : vector<2x32xf32>
    %125 = arith.mulf %121, %120 : vector<2x32xf32>
    %126 = arith.addf %124, %125 : vector<2x32xf32>
    %127 = math.tanh %126 : vector<2x32xf32>
    %128 = arith.mulf %123, %127 : vector<2x32xf32>
    %129 = arith.index_cast %c4_i32 : i32 to index
    %c0_30 = arith.constant 0 : index
    %c0_31 = arith.constant 0 : index
    %130 = vector.load %arg3[%129, %c0_30, %c0_31] : memref<8x2x32xf32, #tpu.memory_space<vmem>>, vector<1x2x32xf32>
    %131 = vector.shape_cast %130 : vector<1x2x32xf32> to vector<2x32xf32>
    %132 = vector.shape_cast %128 : vector<2x32xf32> to vector<1x2x32xf32>
    tpu.vector_store %arg3[%129, %c0_30, %c0_31], %132 {strides = array<i32>} : memref<8x2x32xf32, #tpu.memory_space<vmem>>, vector<1x2x32xf32>,
    %c5_i32 = arith.constant 5 : i32
    %133 = arith.index_cast %c5_i32 : i32 to index
    %c0_32 = arith.constant 0 : index
    %c0_33 = arith.constant 0 : index
    %134 = vector.load %arg1[%133, %c0_32, %c0_33] : memref<8x2x128xf32, #tpu.memory_space<vmem>>, vector<1x2x128xf32>
    %135 = vector.shape_cast %134 : vector<1x2x128xf32> to vector<2x128xf32>
    %136 = arith.truncf %128 : vector<2x32xf32> to vector<2x32xbf16>
    %cst_34 = arith.constant dense<0.000000e+00> : vector<2x128xf32>
    %137 = tpu.matmul %136, %0, %cst_34 {dimension_numbers = #tpu.dot_dimension_numbers<[1], [0], [0], [1], [0, 0, 1, 1], [], []>} : vector<2x32xbf16>, vector<32x128xbf16>, vector<2x128xf32> -> vector<2x128xf32>
    %138 = arith.addf %135, %137 : vector<2x128xf32>
    %139 = vector.extract_strided_slice %138 {offsets = [0, 0], sizes = [2, 96], strides = [1, 1]} : vector<2x128xf32> to vector<2x96xf32>
    %140 = arith.negf %139 : vector<2x96xf32>
    %141 = math.exp %140 : vector<2x96xf32>
    %cst_35 = arith.constant 1.000000e+00 : f32
    %142 = vector.broadcast %cst_35 : f32 to vector<2x96xf32>
    %143 = arith.addf %142, %141 : vector<2x96xf32>
    %144 = arith.divf %142, %143 : vector<2x96xf32>
    %145 = vector.extract_strided_slice %138 {offsets = [0, 96], sizes = [2, 32], strides = [1, 1]} : vector<2x128xf32> to vector<2x32xf32>
    %146 = math.tanh %145 : vector<2x32xf32>
    %147 = vector.extract_strided_slice %144 {offsets = [0, 0], sizes = [2, 32], strides = [1, 1]} : vector<2x96xf32> to vector<2x32xf32>
    %148 = vector.extract_strided_slice %144 {offsets = [0, 32], sizes = [2, 32], strides = [1, 1]} : vector<2x96xf32> to vector<2x32xf32>
    %149 = vector.extract_strided_slice %144 {offsets = [0, 64], sizes = [2, 32], strides = [1, 1]} : vector<2x96xf32> to vector<2x32xf32>
    %150 = arith.mulf %148, %126 : vector<2x32xf32>
    %151 = arith.mulf %147, %146 : vector<2x32xf32>
    %152 = arith.addf %150, %151 : vector<2x32xf32>
    %153 = math.tanh %152 : vector<2x32xf32>
    %154 = arith.mulf %149, %153 : vector<2x32xf32>
    %155 = arith.index_cast %c5_i32 : i32 to index
    %c0_36 = arith.constant 0 : index
    %c0_37 = arith.constant 0 : index
    %156 = vector.load %arg3[%155, %c0_36, %c0_37] : memref<8x2x32xf32, #tpu.memory_space<vmem>>, vector<1x2x32xf32>
    %157 = vector.shape_cast %156 : vector<1x2x32xf32> to vector<2x32xf32>
    %158 = vector.shape_cast %154 : vector<2x32xf32> to vector<1x2x32xf32>
    tpu.vector_store %arg3[%155, %c0_36, %c0_37], %158 {strides = array<i32>} : memref<8x2x32xf32, #tpu.memory_space<vmem>>, vector<1x2x32xf32>,
    %c6_i32 = arith.constant 6 : i32
    %159 = arith.index_cast %c6_i32 : i32 to index
    %c0_38 = arith.constant 0 : index
    %c0_39 = arith.constant 0 : index
    %160 = vector.load %arg1[%159, %c0_38, %c0_39] : memref<8x2x128xf32, #tpu.memory_space<vmem>>, vector<1x2x128xf32>
    %161 = vector.shape_cast %160 : vector<1x2x128xf32> to vector<2x128xf32>
    %162 = arith.truncf %154 : vector<2x32xf32> to vector<2x32xbf16>
    %cst_40 = arith.constant dense<0.000000e+00> : vector<2x128xf32>
    %163 = tpu.matmul %162, %0, %cst_40 {dimension_numbers = #tpu.dot_dimension_numbers<[1], [0], [0], [1], [0, 0, 1, 1], [], []>} : vector<2x32xbf16>, vector<32x128xbf16>, vector<2x128xf32> -> vector<2x128xf32>
    %164 = arith.addf %161, %163 : vector<2x128xf32>
    %165 = vector.extract_strided_slice %164 {offsets = [0, 0], sizes = [2, 96], strides = [1, 1]} : vector<2x128xf32> to vector<2x96xf32>
    %166 = arith.negf %165 : vector<2x96xf32>
    %167 = math.exp %166 : vector<2x96xf32>
    %cst_41 = arith.constant 1.000000e+00 : f32
    %168 = vector.broadcast %cst_41 : f32 to vector<2x96xf32>
    %169 = arith.addf %168, %167 : vector<2x96xf32>
    %170 = arith.divf %168, %169 : vector<2x96xf32>
    %171 = vector.extract_strided_slice %164 {offsets = [0, 96], sizes = [2, 32], strides = [1, 1]} : vector<2x128xf32> to vector<2x32xf32>
    %172 = math.tanh %171 : vector<2x32xf32>
    %173 = vector.extract_strided_slice %170 {offsets = [0, 0], sizes = [2, 32], strides = [1, 1]} : vector<2x96xf32> to vector<2x32xf32>
    %174 = vector.extract_strided_slice %170 {offsets = [0, 32], sizes = [2, 32], strides = [1, 1]} : vector<2x96xf32> to vector<2x32xf32>
    %175 = vector.extract_strided_slice %170 {offsets = [0, 64], sizes = [2, 32], strides = [1, 1]} : vector<2x96xf32> to vector<2x32xf32>
    %176 = arith.mulf %174, %152 : vector<2x32xf32>
    %177 = arith.mulf %173, %172 : vector<2x32xf32>
    %178 = arith.addf %176, %177 : vector<2x32xf32>
    %179 = math.tanh %178 : vector<2x32xf32>
    %180 = arith.mulf %175, %179 : vector<2x32xf32>
    %181 = arith.index_cast %c6_i32 : i32 to index
    %c0_42 = arith.constant 0 : index
    %c0_43 = arith.constant 0 : index
    %182 = vector.load %arg3[%181, %c0_42, %c0_43] : memref<8x2x32xf32, #tpu.memory_space<vmem>>, vector<1x2x32xf32>
    %183 = vector.shape_cast %182 : vector<1x2x32xf32> to vector<2x32xf32>
    %184 = vector.shape_cast %180 : vector<2x32xf32> to vector<1x2x32xf32>
    tpu.vector_store %arg3[%181, %c0_42, %c0_43], %184 {strides = array<i32>} : memref<8x2x32xf32, #tpu.memory_space<vmem>>, vector<1x2x32xf32>,
    %c7_i32 = arith.constant 7 : i32
    %185 = arith.index_cast %c7_i32 : i32 to index
    %c0_44 = arith.constant 0 : index
    %c0_45 = arith.constant 0 : index
    %186 = vector.load %arg1[%185, %c0_44, %c0_45] : memref<8x2x128xf32, #tpu.memory_space<vmem>>, vector<1x2x128xf32>
    %187 = vector.shape_cast %186 : vector<1x2x128xf32> to vector<2x128xf32>
    %188 = arith.truncf %180 : vector<2x32xf32> to vector<2x32xbf16>
    %cst_46 = arith.constant dense<0.000000e+00> : vector<2x128xf32>
    %189 = tpu.matmul %188, %0, %cst_46 {dimension_numbers = #tpu.dot_dimension_numbers<[1], [0], [0], [1], [0, 0, 1, 1], [], []>} : vector<2x32xbf16>, vector<32x128xbf16>, vector<2x128xf32> -> vector<2x128xf32>
    %190 = arith.addf %187, %189 : vector<2x128xf32>
    %191 = vector.extract_strided_slice %190 {offsets = [0, 0], sizes = [2, 96], strides = [1, 1]} : vector<2x128xf32> to vector<2x96xf32>
    %192 = arith.negf %191 : vector<2x96xf32>
    %193 = math.exp %192 : vector<2x96xf32>
    %cst_47 = arith.constant 1.000000e+00 : f32
    %194 = vector.broadcast %cst_47 : f32 to vector<2x96xf32>
    %195 = arith.addf %194, %193 : vector<2x96xf32>
    %196 = arith.divf %194, %195 : vector<2x96xf32>
    %197 = vector.extract_strided_slice %190 {offsets = [0, 96], sizes = [2, 32], strides = [1, 1]} : vector<2x128xf32> to vector<2x32xf32>
    %198 = math.tanh %197 : vector<2x32xf32>
    %199 = vector.extract_strided_slice %196 {offsets = [0, 0], sizes = [2, 32], strides = [1, 1]} : vector<2x96xf32> to vector<2x32xf32>
    %200 = vector.extract_strided_slice %196 {offsets = [0, 32], sizes = [2, 32], strides = [1, 1]} : vector<2x96xf32> to vector<2x32xf32>
    %201 = vector.extract_strided_slice %196 {offsets = [0, 64], sizes = [2, 32], strides = [1, 1]} : vector<2x96xf32> to vector<2x32xf32>
    %202 = arith.mulf %200, %178 : vector<2x32xf32>
    %203 = arith.mulf %199, %198 : vector<2x32xf32>
    %204 = arith.addf %202, %203 : vector<2x32xf32>
    %205 = math.tanh %204 : vector<2x32xf32>
    %206 = arith.mulf %201, %205 : vector<2x32xf32>
    %207 = arith.index_cast %c7_i32 : i32 to index
    %c0_48 = arith.constant 0 : index
    %c0_49 = arith.constant 0 : index
    %208 = vector.load %arg3[%207, %c0_48, %c0_49] : memref<8x2x32xf32, #tpu.memory_space<vmem>>, vector<1x2x32xf32>
    %209 = vector.shape_cast %208 : vector<1x2x32xf32> to vector<2x32xf32>
    %210 = vector.shape_cast %206 : vector<2x32xf32> to vector<1x2x32xf32>
    tpu.vector_store %arg3[%207, %c0_48, %c0_49], %210 {strides = array<i32>} : memref<8x2x32xf32, #tpu.memory_space<vmem>>, vector<1x2x32xf32>,
    %c8_i32 = arith.constant 8 : i32
    return
  }
  func.func @transform_0(%arg0: i32) -> (i32, i32, i32) {
    %c0_i32 = arith.constant 0 : i32
    %c0_i32_0 = arith.constant 0 : i32
    %c0_i32_1 = arith.constant 0 : i32
    %c0_i32_2 = arith.constant 0 : i32
    return %c0_i32, %c0_i32_0, %c0_i32_1 : i32, i32, i32
  }
  func.func @transform_1(%arg0: i32) -> (i32, i32) {
    %c0_i32 = arith.constant 0 : i32
    %c0_i32_0 = arith.constant 0 : i32
    %c0_i32_1 = arith.constant 0 : i32
    return %c0_i32, %c0_i32_0 : i32, i32
  }
  func.func @transform_2(%arg0: i32) -> (i32, i32, i32) {
    %c0_i32 = arith.constant 0 : i32
    %c0_i32_0 = arith.constant 0 : i32
    %c0_i32_1 = arith.constant 0 : i32
    %c0_i32_2 = arith.constant 0 : i32
    return %c0_i32, %c0_i32_0, %c0_i32_1 : i32, i32, i32
  }
}

module attributes {stable_mosaic.version = 11 : i64} {
  func.func @attn_kernel(%arg0: i32, %arg1: memref<1x8x32xf32, #tpu.memory_space<vmem>>, %arg2: memref<32x128xbf16, #tpu.memory_space<vmem>>, %arg3: memref<4x1x1xf32, #tpu.memory_space<vmem>>, %arg4: memref<1x2x8x8xf32, #tpu.memory_space<vmem>>, %arg5: memref<1x1x1xf32, #tpu.memory_space<vmem>>) attributes {dimension_semantics = [#tpu.dimension_semantics<parallel>], iteration_bounds = array<i64: 2>, scalar_prefetch = 0 : i64, scratch_operands = 0 : i64, tpu.core_type = #tpu.core_type<tc>, window_params = [{transform_indices = @transform_0, window_bounds = array<i64: 1, 8, 32>}, {pipeline_mode = #tpu.pipeline_mode<synchronous>, transform_indices = @transform_1, window_bounds = array<i64: 32, 128>}, {pipeline_mode = #tpu.pipeline_mode<synchronous>, transform_indices = @transform_2, window_bounds = array<i64: 4, 1, 1>}, {transform_indices = @transform_3, window_bounds = array<i64: 1, 2, 8, 8>}, {transform_indices = @transform_4, window_bounds = array<i64: 1, 1, 1>}]} {
    %c0 = arith.constant 0 : index
    %c0_0 = arith.constant 0 : index
    %c0_1 = arith.constant 0 : index
    %0 = vector.load %arg1[%c0, %c0_0, %c0_1] : memref<1x8x32xf32, #tpu.memory_space<vmem>>, vector<1x8x32xf32>
    %1 = vector.shape_cast %0 : vector<1x8x32xf32> to vector<8x32xf32>
    %2 = arith.truncf %1 : vector<8x32xf32> to vector<8x32xbf16>
    %3 = tpu.transpose %1, [1, 0] : vector<8x32xf32> -> vector<32x8xf32>
    %4 = arith.truncf %3 : vector<32x8xf32> to vector<32x8xbf16>
    %c0_2 = arith.constant 0 : index
    %c0_3 = arith.constant 0 : index
    %5 = vector.load %arg2[%c0_2, %c0_3] : memref<32x128xbf16, #tpu.memory_space<vmem>>, vector<32x128xbf16>
    %c0_4 = arith.constant 0 : index
    %c0_5 = arith.constant 0 : index
    %c0_6 = arith.constant 0 : index
    %6 = vector.load %arg3[%c0_4, %c0_5, %c0_6] : memref<4x1x1xf32, #tpu.memory_space<vmem>>, vector<4x1x1xf32>
    %cst = arith.constant dense<0.000000e+00> : vector<8x128xf32>
    %7 = tpu.matmul %2, %5, %cst {dimension_numbers = #tpu.dot_dimension_numbers<[1], [0], [0], [1], [0, 0, 1, 1], [], []>} : vector<8x32xbf16>, vector<32x128xbf16>, vector<8x128xf32> -> vector<8x128xf32>
    %8 = tpu.iota {dimensions = array<i32: 0>} : vector<8x8xi32>
    %9 = tpu.iota {dimensions = array<i32: 1>} : vector<8x8xi32>
    %10 = arith.cmpi eq, %8, %9 : vector<8x8xi32>
    %11 = arith.extui %10 : vector<8x8xi1> to vector<8x8xi32>
    %12 = arith.sitofp %11 : vector<8x8xi32> to vector<8x8xf32>
    %cst_7 = arith.constant 0.000000e+00 : f32
    %13 = vector.broadcast %cst_7 : f32 to vector<8x8xf32>
    %14 = vector.extract_strided_slice %7 {offsets = [0, 0], sizes = [8, 32], strides = [1, 1]} : vector<8x128xf32> to vector<8x32xf32>
    %15 = arith.truncf %14 : vector<8x32xf32> to vector<8x32xbf16>
    %cst_8 = arith.constant dense<0.000000e+00> : vector<8x8xf32>
    %16 = tpu.matmul %15, %4, %cst_8 {dimension_numbers = #tpu.dot_dimension_numbers<[1], [0], [0], [1], [0, 0, 1, 1], [], []>} : vector<8x32xbf16>, vector<32x8xbf16>, vector<8x8xf32> -> vector<8x8xf32>
    %17 = vector.extract_strided_slice %6 {offsets = [0, 0, 0], sizes = [1, 1, 1], strides = [1, 1, 1]} : vector<4x1x1xf32> to vector<1x1x1xf32>
    %18 = vector.shape_cast %17 : vector<1x1x1xf32> to vector<1x1xf32>
    %19 = vector.broadcast %18 : vector<1x1xf32> to vector<8x8xf32>
    %20 = arith.addf %16, %19 : vector<8x8xf32>
    %21 = math.tanh %20 : vector<8x8xf32>
    %cst_9 = arith.constant dense<0xFF800000> : vector<8xf32>
    %22 = vector.multi_reduction <maximumf>, %21, %cst_9 [0] : vector<8x8xf32> to vector<8xf32>
    %cst_10 = arith.constant 0xFF800000 : f32
    %23 = vector.broadcast %cst_10 : f32 to vector<8xf32>
    %24 = arith.maximumf %23, %22 : vector<8xf32>
    %25 = vector.shape_cast %24 : vector<8xf32> to vector<1x8xf32>
    %26 = vector.broadcast %25 : vector<1x8xf32> to vector<8x8xf32>
    %27 = arith.subf %21, %26 : vector<8x8xf32>
    %28 = math.exp %27 : vector<8x8xf32>
    %cst_11 = arith.constant dense<0.000000e+00> : vector<8xf32>
    %29 = vector.multi_reduction <add>, %28, %cst_11 [0] : vector<8x8xf32> to vector<8xf32>
    %30 = vector.shape_cast %29 : vector<8xf32> to vector<1x8xf32>
    %31 = vector.broadcast %30 : vector<1x8xf32> to vector<8x8xf32>
    %32 = arith.divf %28, %31 : vector<8x8xf32>
    %c0_12 = arith.constant 0 : index
    %c0_13 = arith.constant 0 : index
    %c0_14 = arith.constant 0 : index
    %c0_15 = arith.constant 0 : index
    %33 = vector.load %arg4[%c0_12, %c0_13, %c0_14, %c0_15] : memref<1x2x8x8xf32, #tpu.memory_space<vmem>>, vector<1x1x8x8xf32>
    %34 = vector.shape_cast %33 : vector<1x1x8x8xf32> to vector<8x8xf32>
    %35 = vector.shape_cast %32 : vector<8x8xf32> to vector<1x1x8x8xf32>
    tpu.vector_store %arg4[%c0_12, %c0_13, %c0_14, %c0_15], %35 {strides = array<i32>} : memref<1x2x8x8xf32, #tpu.memory_space<vmem>>, vector<1x1x8x8xf32>,
    %cst_16 = arith.constant dense<0.000000e+00> : vector<8x8xf32>
    %36 = tpu.matmul %32, %32, %cst_16 {dimension_numbers = #tpu.dot_dimension_numbers<[0], [0], [1], [1], [0, 1, 1, 1], [], []>} : vector<8x8xf32>, vector<8x8xf32>, vector<8x8xf32> -> vector<8x8xf32>
    %37 = arith.addf %13, %36 : vector<8x8xf32>
    %38 = vector.extract_strided_slice %7 {offsets = [0, 32], sizes = [8, 32], strides = [1, 1]} : vector<8x128xf32> to vector<8x32xf32>
    %39 = arith.truncf %38 : vector<8x32xf32> to vector<8x32xbf16>
    %cst_17 = arith.constant dense<0.000000e+00> : vector<8x8xf32>
    %40 = tpu.matmul %39, %4, %cst_17 {dimension_numbers = #tpu.dot_dimension_numbers<[1], [0], [0], [1], [0, 0, 1, 1], [], []>} : vector<8x32xbf16>, vector<32x8xbf16>, vector<8x8xf32> -> vector<8x8xf32>
    %41 = vector.extract_strided_slice %6 {offsets = [1, 0, 0], sizes = [1, 1, 1], strides = [1, 1, 1]} : vector<4x1x1xf32> to vector<1x1x1xf32>
    %42 = vector.shape_cast %41 : vector<1x1x1xf32> to vector<1x1xf32>
    %43 = vector.broadcast %42 : vector<1x1xf32> to vector<8x8xf32>
    %44 = arith.addf %40, %43 : vector<8x8xf32>
    %45 = math.tanh %44 : vector<8x8xf32>
    %cst_18 = arith.constant dense<0xFF800000> : vector<8xf32>
    %46 = vector.multi_reduction <maximumf>, %45, %cst_18 [0] : vector<8x8xf32> to vector<8xf32>
    %cst_19 = arith.constant 0xFF800000 : f32
    %47 = vector.broadcast %cst_19 : f32 to vector<8xf32>
    %48 = arith.maximumf %47, %46 : vector<8xf32>
    %49 = vector.shape_cast %48 : vector<8xf32> to vector<1x8xf32>
    %50 = vector.broadcast %49 : vector<1x8xf32> to vector<8x8xf32>
    %51 = arith.subf %45, %50 : vector<8x8xf32>
    %52 = math.exp %51 : vector<8x8xf32>
    %cst_20 = arith.constant dense<0.000000e+00> : vector<8xf32>
    %53 = vector.multi_reduction <add>, %52, %cst_20 [0] : vector<8x8xf32> to vector<8xf32>
    %54 = vector.shape_cast %53 : vector<8xf32> to vector<1x8xf32>
    %55 = vector.broadcast %54 : vector<1x8xf32> to vector<8x8xf32>
    %56 = arith.divf %52, %55 : vector<8x8xf32>
    %c0_21 = arith.constant 0 : index
    %c1 = arith.constant 1 : index
    %c0_22 = arith.constant 0 : index
    %c0_23 = arith.constant 0 : index
    %57 = vector.load %arg4[%c0_21, %c1, %c0_22, %c0_23] : memref<1x2x8x8xf32, #tpu.memory_space<vmem>>, vector<1x1x8x8xf32>
    %58 = vector.shape_cast %57 : vector<1x1x8x8xf32> to vector<8x8xf32>
    %59 = vector.shape_cast %56 : vector<8x8xf32> to vector<1x1x8x8xf32>
    tpu.vector_store %arg4[%c0_21, %c1, %c0_22, %c0_23], %59 {strides = array<i32>} : memref<1x2x8x8xf32, #tpu.memory_space<vmem>>, vector<1x1x8x8xf32>,
    %cst_24 = arith.constant dense<0.000000e+00> : vector<8x8xf32>
    %60 = tpu.matmul %56, %56, %cst_24 {dimension_numbers = #tpu.dot_dimension_numbers<[0], [0], [1], [1], [0, 1, 1, 1], [], []>} : vector<8x8xf32>, vector<8x8xf32>, vector<8x8xf32> -> vector<8x8xf32>
    %61 = arith.addf %37, %60 : vector<8x8xf32>
    %62 = vector.extract_strided_slice %7 {offsets = [0, 64], sizes = [8, 32], strides = [1, 1]} : vector<8x128xf32> to vector<8x32xf32>
    %63 = arith.truncf %62 : vector<8x32xf32> to vector<8x32xbf16>
    %cst_25 = arith.constant dense<0.000000e+00> : vector<8x8xf32>
    %64 = tpu.matmul %63, %4, %cst_25 {dimension_numbers = #tpu.dot_dimension_numbers<[1], [0], [0], [1], [0, 0, 1, 1], [], []>} : vector<8x32xbf16>, vector<32x8xbf16>, vector<8x8xf32> -> vector<8x8xf32>
    %65 = vector.extract_strided_slice %6 {offsets = [2, 0, 0], sizes = [1, 1, 1], strides = [1, 1, 1]} : vector<4x1x1xf32> to vector<1x1x1xf32>
    %66 = vector.shape_cast %65 : vector<1x1x1xf32> to vector<1x1xf32>
    %67 = vector.broadcast %66 : vector<1x1xf32> to vector<8x8xf32>
    %68 = arith.addf %64, %67 : vector<8x8xf32>
    %69 = math.tanh %68 : vector<8x8xf32>
    %cst_26 = arith.constant dense<0xFF800000> : vector<8xf32>
    %70 = vector.multi_reduction <maximumf>, %69, %cst_26 [0] : vector<8x8xf32> to vector<8xf32>
    %cst_27 = arith.constant 0xFF800000 : f32
    %71 = vector.broadcast %cst_27 : f32 to vector<8xf32>
    %72 = arith.maximumf %71, %70 : vector<8xf32>
    %73 = vector.shape_cast %72 : vector<8xf32> to vector<1x8xf32>
    %74 = vector.broadcast %73 : vector<1x8xf32> to vector<8x8xf32>
    %75 = arith.subf %69, %74 : vector<8x8xf32>
    %76 = math.exp %75 : vector<8x8xf32>
    %cst_28 = arith.constant dense<0.000000e+00> : vector<8xf32>
    %77 = vector.multi_reduction <add>, %76, %cst_28 [0] : vector<8x8xf32> to vector<8xf32>
    %78 = vector.shape_cast %77 : vector<8xf32> to vector<1x8xf32>
    %79 = vector.broadcast %78 : vector<1x8xf32> to vector<8x8xf32>
    %80 = arith.divf %76, %79 : vector<8x8xf32>
    %cst_29 = arith.constant dense<0.000000e+00> : vector<8x8xf32>
    %81 = tpu.matmul %80, %80, %cst_29 {dimension_numbers = #tpu.dot_dimension_numbers<[0], [0], [1], [1], [0, 1, 1, 1], [], []>} : vector<8x8xf32>, vector<8x8xf32>, vector<8x8xf32> -> vector<8x8xf32>
    %82 = arith.addf %61, %81 : vector<8x8xf32>
    %83 = vector.extract_strided_slice %7 {offsets = [0, 96], sizes = [8, 32], strides = [1, 1]} : vector<8x128xf32> to vector<8x32xf32>
    %84 = arith.truncf %83 : vector<8x32xf32> to vector<8x32xbf16>
    %cst_30 = arith.constant dense<0.000000e+00> : vector<8x8xf32>
    %85 = tpu.matmul %84, %4, %cst_30 {dimension_numbers = #tpu.dot_dimension_numbers<[1], [0], [0], [1], [0, 0, 1, 1], [], []>} : vector<8x32xbf16>, vector<32x8xbf16>, vector<8x8xf32> -> vector<8x8xf32>
    %86 = vector.extract_strided_slice %6 {offsets = [3, 0, 0], sizes = [1, 1, 1], strides = [1, 1, 1]} : vector<4x1x1xf32> to vector<1x1x1xf32>
    %87 = vector.shape_cast %86 : vector<1x1x1xf32> to vector<1x1xf32>
    %88 = vector.broadcast %87 : vector<1x1xf32> to vector<8x8xf32>
    %89 = arith.addf %85, %88 : vector<8x8xf32>
    %90 = math.tanh %89 : vector<8x8xf32>
    %cst_31 = arith.constant dense<0xFF800000> : vector<8xf32>
    %91 = vector.multi_reduction <maximumf>, %90, %cst_31 [0] : vector<8x8xf32> to vector<8xf32>
    %cst_32 = arith.constant 0xFF800000 : f32
    %92 = vector.broadcast %cst_32 : f32 to vector<8xf32>
    %93 = arith.maximumf %92, %91 : vector<8xf32>
    %94 = vector.shape_cast %93 : vector<8xf32> to vector<1x8xf32>
    %95 = vector.broadcast %94 : vector<1x8xf32> to vector<8x8xf32>
    %96 = arith.subf %90, %95 : vector<8x8xf32>
    %97 = math.exp %96 : vector<8x8xf32>
    %cst_33 = arith.constant dense<0.000000e+00> : vector<8xf32>
    %98 = vector.multi_reduction <add>, %97, %cst_33 [0] : vector<8x8xf32> to vector<8xf32>
    %99 = vector.shape_cast %98 : vector<8xf32> to vector<1x8xf32>
    %100 = vector.broadcast %99 : vector<1x8xf32> to vector<8x8xf32>
    %101 = arith.divf %97, %100 : vector<8x8xf32>
    %cst_34 = arith.constant dense<0.000000e+00> : vector<8x8xf32>
    %102 = tpu.matmul %101, %101, %cst_34 {dimension_numbers = #tpu.dot_dimension_numbers<[0], [0], [1], [1], [0, 1, 1, 1], [], []>} : vector<8x8xf32>, vector<8x8xf32>, vector<8x8xf32> -> vector<8x8xf32>
    %103 = arith.addf %82, %102 : vector<8x8xf32>
    %104 = arith.subf %103, %12 : vector<8x8xf32>
    %cst_35 = arith.constant 0.000000e+00 : f32
    %105 = vector.broadcast %cst_35 : f32 to vector<1x1x1xf32>
    %106 = arith.mulf %104, %104 : vector<8x8xf32>
    %107 = vector.shape_cast %106 : vector<8x8xf32> to vector<1x8x8xf32>
    %cst_36 = arith.constant dense<0.000000e+00> : vector<1xf32>
    %108 = vector.multi_reduction <add>, %107, %cst_36 [1, 2] : vector<1x8x8xf32> to vector<1xf32>
    %109 = vector.shape_cast %108 : vector<1xf32> to vector<1x1x1xf32>
    %110 = vector.extract %109[0, 0, 0] : f32 from vector<1x1x1xf32>
    %111 = vector.broadcast %110 : f32 to vector<1x1x1xf32>
    %112 = arith.addf %105, %111 : vector<1x1x1xf32>
    %c0_37 = arith.constant 0 : index
    %c0_38 = arith.constant 0 : index
    %c0_39 = arith.constant 0 : index
    %113 = vector.load %arg5[%c0_37, %c0_38, %c0_39] : memref<1x1x1xf32, #tpu.memory_space<vmem>>, vector<1x1x1xf32>
    tpu.vector_store %arg5[%c0_37, %c0_38, %c0_39], %112 {strides = array<i32>} : memref<1x1x1xf32, #tpu.memory_space<vmem>>, vector<1x1x1xf32>,
    return
  }
  func.func @transform_0(%arg0: i32) -> (i32, i32, i32) {
    %c0_i32 = arith.constant 0 : i32
    %c0_i32_0 = arith.constant 0 : i32
    %c0_i32_1 = arith.constant 0 : i32
    return %arg0, %c0_i32, %c0_i32_0 : i32, i32, i32
  }
  func.func @transform_1(%arg0: i32) -> (i32, i32) {
    %c0_i32 = arith.constant 0 : i32
    %c0_i32_0 = arith.constant 0 : i32
    %c0_i32_1 = arith.constant 0 : i32
    return %c0_i32, %c0_i32_0 : i32, i32
  }
  func.func @transform_2(%arg0: i32) -> (i32, i32, i32) {
    %c0_i32 = arith.constant 0 : i32
    %c0_i32_0 = arith.constant 0 : i32
    %c0_i32_1 = arith.constant 0 : i32
    %c0_i32_2 = arith.constant 0 : i32
    return %c0_i32, %c0_i32_0, %c0_i32_1 : i32, i32, i32
  }
  func.func @transform_3(%arg0: i32) -> (i32, i32, i32, i32) {
    %c0_i32 = arith.constant 0 : i32
    %c0_i32_0 = arith.constant 0 : i32
    %c0_i32_1 = arith.constant 0 : i32
    %c0_i32_2 = arith.constant 0 : i32
    return %arg0, %c0_i32, %c0_i32_0, %c0_i32_1 : i32, i32, i32, i32
  }
  func.func @transform_4(%arg0: i32) -> (i32, i32, i32) {
    %c0_i32 = arith.constant 0 : i32
    %c0_i32_0 = arith.constant 0 : i32
    %c0_i32_1 = arith.constant 0 : i32
    return %arg0, %c0_i32, %c0_i32_0 : i32, i32, i32
  }
}

</mosaic_0001>

<bundles_post_ra>
// kernel: man_forward.2
= control target key start
LH: loop header
LB: loop body
LE: loop exit
PB: predicated region body
PF: predicated region fallthrough
CT: control target
= control target key end

     0   :  { %v662_v2 = vmov 0   ;;  %s664_s15 = smov 64   ;;  %vm29_vm4 = vcmask 261120   ;;  %s818_s1 = inlined_call_operand.vmem [shape: bf16[32,128], index: 1, kind: input, shape index: {}]   ;;  %s819_s0 = inlined_call_operand.vmem [shape: f32[8,2,128], index: 0, kind: input, shape index: {}]   ;;  %s820_s2 = inlined_call_operand.vmem [shape: f32[8,2,32], index: 2, kind: output, shape index: {}]  }
   0x1   :  { %v594_v0 = vld [vmem:[%s818_s1 + $0x8] sm:$0xff]  ;;  %v593_v1 = vld [vmem:[%s818_s1] sm:$0xff]  ;;  %s663_s1 = smov 32  }
   0x2   :  { %39 = vmatpush.bf16.msra.mxu0 %v594_v0  ;;  %105 = vmatpush.bf16.msra.mxu1 %v594_v0  ;;  %v16_v3 = vld [vmem:[%s819_s0] sm:$0x3]  ;;  %v565_v31 = vld [vmem:[%s819_s0 + $0x2] sm:$0x3]  ;;  %v569_v59 = vld [vmem:[%s819_s0 + $0x4] sm:$0x3] }
   0x3   :  { %171 = vmatpush.bf16.msra.mxu2 %v594_v0  ;;  %237 = vmatpush.bf16.msra.mxu3 %v594_v0 }
   0x6   :  { %40 = vmatpush.bf16.msra.mxu0 %v593_v1  ;;  %106 = vmatpush.bf16.msra.mxu1 %v593_v1 }
   0x7   :  { %172 = vmatpush.bf16.msra.mxu2 %v593_v1  ;;  %238 = vmatpush.bf16.msra.mxu3 %v593_v1 }
   0x9   :  { %41 = vmatmul.bf16.vlgmr.msra.gmra.mxu0 %v662_v2 }
   0xa   :  { %303 = vmatpush.bf16.msrb.mxu0 %v594_v0  ;;  %369 = vmatpush.bf16.msrb.mxu1 %v594_v0 }
   0xb   :  { %435 = vmatpush.bf16.msrb.mxu2 %v594_v0  ;;  %501 = vmatpush.bf16.msrb.mxu3 %v594_v0 }
   0xe   :  { %304 = vmatpush.bf16.msrb.mxu0 %v593_v1  ;;  %370 = vmatpush.bf16.msrb.mxu1 %v593_v1 }
   0xf   :  { %436 = vmatpush.bf16.msrb.mxu2 %v593_v1  ;;  %502 = vmatpush.bf16.msrb.mxu3 %v593_v1 }
  0x86   :  { %v42_v4 = vpop.f32.mrf.mxu0 }
  0x87   :  { %v46_v5 = vadd.f32 %v42_v4, %v16_v3 }
  0x89   :  { %598 = vtanh.f32 %v46_v5  ;;  %v564_v8 = vmul.f32 -1.442695, %v46_v5 }
  0x8b   :  { %600 = vpow2.f32 %v564_v8 }
  0x8e   :  { %v44_v6 = vpop.f32.mrf.mxu0 }
  0x8f   :  { %v599_v7 = vpop.eup %598 }
  0x90   :  { %69 = vrot.lane.b32.xlu0 %v599_v7, %s663_s1 }
  0x91   :  { %v601_v9 = vpop.eup %600 }
  0x92   :  { %v50_v10 = vadd.f32 1.0, %v601_v9 }
  0x94   :  { %602 = vrcp.f32 %v50_v10  ;;  %v62_v16 = vand.u32 2147483648, %v50_v10  ;;  %vm56_vm1 = vweird.f32 %v50_v10  ;;  %v60_v17 = vand.u32 2147483647, %v50_v10 }
  0x96   :  { %v63_v19 = vor.u32 1.1754944e-38, %v62_v16  ;;  %vm61_vm3 = vcmp.eq.f32.partialorder %v60_v17, 8.507059e+37 }
  0x9a   :  { %v603_v11 = vpop.eup %602 }
  0x9b   :  { %v52_v12 = vmul.f32 %v603_v11, %v50_v10  ;;  %vm57_vm0 = vweird.f32 %v603_v11 }
  0x9c   :  { %vm58_vm2 = vmor %vm56_vm1, %vm57_vm0 }
  0x9d   :  { %v53_v13 = vsub.f32 1.0, %v52_v12 }
  0x9f   :  { %v54_v14 = vmul.f32 %v603_v11, %v53_v13 }
  0xa1   :  { %v55_v15 = vadd.f32 %v603_v11, %v54_v14 }
  0xa3   :  { %v59_v18 = vsel %vm58_vm2, %v603_v11, %v55_v15 }
  0xa4   :  { %v64_v21 = vsel %vm61_vm3, %v63_v19, %v59_v18 }
  0xa5   :  { %v67_v23 = vmul.f32 0.0, %v64_v21 }
 0x102   :  { %v70_v20 = vpop.permute.xlu0 %69 }
 0x103   :  { %v72_v22 = vmul.f32 %v70_v20, %v64_v21 }
 0x105   :  { %74 = vrot.lane.b32.xlu0 %v72_v22, %s663_s1 }
 0x177   :  { %v75_v24 = vpop.permute.xlu0 %74 }
 0x178   :  { %v77_v25 = vadd.f32 %v75_v24, %v67_v23  ;;  %v573_v23 = vld [vmem:[%s819_s0 + $0x6] sm:$0x3] }
 0x17a   :  { %604 = vtanh.f32 %v77_v25 }
 0x180   :  { %v605_v26 = vpop.eup %604 }
 0x181   :  { %80 = vrot.lane.b32.xlu1 %v605_v26, %s663_s1 }
 0x1f3   :  { %v81_v27 = vpop.permute.xlu1 %80 }
 0x1f4   :  { %v692_v28 = vmul.f32 %v81_v27, %v64_v21 }
 0x1f6   :  { %v92_v29 = vpack.c.bf16 %v692_v28, %v692_v28 }
 0x1f8   :  { %94 = vrot.lane.b32.xlu1 %v92_v29, %s664_s15 }
 0x26a   :  { %v95_v30 = vpop.permute.xlu1 %94 }
 0x26b   :  { %566 = vmatmul.msk.bf16.vlgmr.msra.gmra.mxu1 %vm29_vm4, %v95_v30 }
 0x2e8   :  { %v108_v32 = vpop.f32.mrf.mxu1 }
 0x2e9   :  { %v112_v33 = vadd.f32 %v565_v31, %v108_v32 }
 0x2eb   :  { %606 = vtanh.f32 %v112_v33  ;;  %v567_v36 = vmul.f32 -1.442695, %v112_v33 }
 0x2ed   :  { %608 = vpow2.f32 %v567_v36 }
 0x2f0   :  { %v110_v34 = vpop.f32.mrf.mxu1 }
 0x2f1   :  { %v607_v35 = vpop.eup %606 }
 0x2f2   :  { %135 = vrot.lane.b32.xlu2 %v607_v35, %s663_s1 }
 0x2f3   :  { %v609_v37 = vpop.eup %608 }
 0x2f4   :  { %v116_v38 = vadd.f32 1.0, %v609_v37 }
 0x2f6   :  { %610 = vrcp.f32 %v116_v38  ;;  %v128_v44 = vand.u32 2147483648, %v116_v38  ;;  %vm122_vm6 = vweird.f32 %v116_v38  ;;  %v126_v45 = vand.u32 2147483647, %v116_v38 }
 0x2f8   :  { %v129_v47 = vor.u32 1.1754944e-38, %v128_v44  ;;  %vm127_vm8 = vcmp.eq.f32.partialorder %v126_v45, 8.507059e+37 }
 0x2fc   :  { %v611_v39 = vpop.eup %610 }
 0x2fd   :  { %v118_v40 = vmul.f32 %v611_v39, %v116_v38  ;;  %vm123_vm5 = vweird.f32 %v611_v39 }
 0x2fe   :  { %vm124_vm7 = vmor %vm122_vm6, %vm123_vm5 }
 0x2ff   :  { %v119_v41 = vsub.f32 1.0, %v118_v40 }
 0x301   :  { %v120_v42 = vmul.f32 %v611_v39, %v119_v41 }
 0x303   :  { %v121_v43 = vadd.f32 %v611_v39, %v120_v42 }
 0x305   :  { %v125_v46 = vsel %vm124_vm7, %v611_v39, %v121_v43 }
 0x306   :  { %v130_v49 = vsel %vm127_vm8, %v129_v47, %v125_v46 }
 0x307   :  { %v133_v51 = vmul.f32 %v130_v49, %v77_v25 }
 0x34c   :  { %v136_v48 = vpop.permute.xlu2 %135 }
 0x34d   :  { %v138_v50 = vmul.f32 %v136_v48, %v130_v49 }
 0x34f   :  { %140 = vrot.lane.b32.xlu2 %v138_v50, %s663_s1 }
 0x3a9   :  { %v141_v52 = vpop.permute.xlu2 %140 }
 0x3aa   :  { %v143_v53 = vadd.f32 %v141_v52, %v133_v51  ;;  %v577_v52 = vld [vmem:[%s819_s0 + $0x8] sm:$0x3] }
 0x3ac   :  { %612 = vtanh.f32 %v143_v53 }
 0x3b2   :  { %v613_v54 = vpop.eup %612 }
 0x3b3   :  { %146 = vrot.lane.b32.xlu0 %v613_v54, %s663_s1 }
 0x425   :  { %v147_v55 = vpop.permute.xlu0 %146 }
 0x426   :  { %v704_v56 = vmul.f32 %v147_v55, %v130_v49 }
 0x428   :  { %v158_v57 = vpack.c.bf16 %v704_v56, %v704_v56 }
 0x42a   :  { %160 = vrot.lane.b32.xlu1 %v158_v57, %s664_s15 }
 0x49c   :  { %v161_v58 = vpop.permute.xlu1 %160 }
 0x49d   :  { %570 = vmatmul.msk.bf16.vlgmr.msra.gmra.mxu2 %vm29_vm4, %v161_v58 }
 0x520   :  { %v174_v60 = vpop.f32.mrf.mxu2 }
 0x521   :  { %v178_v61 = vadd.f32 %v569_v59, %v174_v60 }
 0x523   :  { %614 = vtanh.f32 %v178_v61  ;;  %v571_v0 = vmul.f32 -1.442695, %v178_v61 }
 0x525   :  { %616 = vpow2.f32 %v571_v0 }
 0x528   :  { %v176_v62 = vpop.f32.mrf.mxu2 }
 0x529   :  { %v615_v63 = vpop.eup %614 }
 0x52a   :  { %201 = vrot.lane.b32.xlu2 %v615_v63, %s663_s1 }
 0x52b   :  { %v617_v1 = vpop.eup %616 }
 0x52c   :  { %v182_v2 = vadd.f32 1.0, %v617_v1 }
 0x52e   :  { %618 = vrcp.f32 %v182_v2  ;;  %v194_v8 = vand.u32 2147483648, %v182_v2  ;;  %vm188_vm10 = vweird.f32 %v182_v2  ;;  %v192_v9 = vand.u32 2147483647, %v182_v2 }
 0x530   :  { %v195_v11 = vor.u32 1.1754944e-38, %v194_v8  ;;  %vm193_vm12 = vcmp.eq.f32.partialorder %v192_v9, 8.507059e+37 }
 0x534   :  { %v619_v3 = vpop.eup %618 }
 0x535   :  { %v184_v4 = vmul.f32 %v619_v3, %v182_v2  ;;  %vm189_vm9 = vweird.f32 %v619_v3 }
 0x536   :  { %vm190_vm11 = vmor %vm188_vm10, %vm189_vm9 }
 0x537   :  { %v185_v5 = vsub.f32 1.0, %v184_v4 }
 0x539   :  { %v186_v6 = vmul.f32 %v619_v3, %v185_v5 }
 0x53b   :  { %v187_v7 = vadd.f32 %v619_v3, %v186_v6 }
 0x53d   :  { %v191_v10 = vsel %vm190_vm11, %v619_v3, %v187_v7 }
 0x53e   :  { %v196_v13 = vsel %vm193_vm12, %v195_v11, %v191_v10 }
 0x53f   :  { %v199_v15 = vmul.f32 %v196_v13, %v143_v53 }
 0x584   :  { %v202_v12 = vpop.permute.xlu2 %201 }
 0x585   :  { %v204_v14 = vmul.f32 %v202_v12, %v196_v13 }
 0x587   :  { %206 = vrot.lane.b32.xlu0 %v204_v14, %s663_s1 }
 0x5f9   :  { %v207_v16 = vpop.permute.xlu0 %206 }
 0x5fa   :  { %v209_v17 = vadd.f32 %v207_v16, %v199_v15 }
 0x5fc   :  { %620 = vtanh.f32 %v209_v17 }
 0x602   :  { %v621_v18 = vpop.eup %620 }
 0x603   :  { %212 = vrot.lane.b32.xlu1 %v621_v18, %s663_s1 }
 0x675   :  { %v213_v19 = vpop.permute.xlu1 %212 }
 0x676   :  { %v716_v20 = vmul.f32 %v213_v19, %v196_v13 }
 0x678   :  { %v224_v21 = vpack.c.bf16 %v716_v20, %v716_v20 }
 0x67a   :  { %226 = vrot.lane.b32.xlu2 %v224_v21, %s664_s15 }
 0x6d4   :  { %v227_v22 = vpop.permute.xlu2 %226 }
 0x6d5   :  { %574 = vmatmul.msk.bf16.vlgmr.msra.gmra.mxu3 %vm29_vm4, %v227_v22 }
 0x758   :  { %v240_v24 = vpop.f32.mrf.mxu3 }
 0x759   :  { %v244_v25 = vadd.f32 %v573_v23, %v240_v24 }
 0x75b   :  { %622 = vtanh.f32 %v244_v25  ;;  %v575_v29 = vmul.f32 -1.442695, %v244_v25 }
 0x75d   :  { %624 = vpow2.f32 %v575_v29 }
 0x760   :  { %v242_v26 = vpop.f32.mrf.mxu3 }
 0x761   :  { %v623_v27 = vpop.eup %622 }
 0x762   :  { %267 = vrot.lane.b32.xlu0 %v623_v27, %s663_s1 }
 0x763   :  { %v625_v30 = vpop.eup %624 }
 0x764   :  { %v248_v31 = vadd.f32 1.0, %v625_v30 }
 0x766   :  { %626 = vrcp.f32 %v248_v31  ;;  %v260_v37 = vand.u32 2147483648, %v248_v31  ;;  %vm254_vm14 = vweird.f32 %v248_v31  ;;  %v258_v38 = vand.u32 2147483647, %v248_v31 }
 0x768   :  { %v261_v40 = vor.u32 1.1754944e-38, %v260_v37  ;;  %vm259_vm0 = vcmp.eq.f32.partialorder %v258_v38, 8.507059e+37 }
 0x76c   :  { %v627_v32 = vpop.eup %626 }
 0x76d   :  { %v250_v33 = vmul.f32 %v627_v32, %v248_v31  ;;  %vm255_vm13 = vweird.f32 %v627_v32 }
 0x76e   :  { %vm256_vm15 = vmor %vm254_vm14, %vm255_vm13 }
 0x76f   :  { %v251_v34 = vsub.f32 1.0, %v250_v33 }
 0x771   :  { %v252_v35 = vmul.f32 %v627_v32, %v251_v34 }
 0x773   :  { %v253_v36 = vadd.f32 %v627_v32, %v252_v35 }
 0x775   :  { %v257_v39 = vsel %vm256_vm15, %v627_v32, %v253_v36 }
 0x776   :  { %v262_v42 = vsel %vm259_vm0, %v261_v40, %v257_v39 }
 0x777   :  { %v265_v44 = vmul.f32 %v262_v42, %v209_v17  ;;  %v581_v17 = vld [vmem:[%s819_s0 + $0xa] sm:$0x3] }
 0x7d4   :  { %v268_v41 = vpop.permute.xlu0 %267 }
 0x7d5   :  { %v270_v43 = vmul.f32 %v268_v41, %v262_v42 }
 0x7d7   :  { %272 = vrot.lane.b32.xlu1 %v270_v43, %s663_s1 }
 0x849   :  { %v273_v45 = vpop.permute.xlu1 %272 }
 0x84a   :  { %v275_v46 = vadd.f32 %v273_v45, %v265_v44 }
 0x84c   :  { %628 = vtanh.f32 %v275_v46 }
 0x852   :  { %v629_v47 = vpop.eup %628 }
 0x853   :  { %278 = vrot.lane.b32.xlu2 %v629_v47, %s663_s1  ;;  %v585_v47 = vld [vmem:[%s819_s0 + $0xc] sm:$0x3] }
 0x8ad   :  { %v279_v48 = vpop.permute.xlu2 %278 }
 0x8ae   :  { %v728_v49 = vmul.f32 %v279_v48, %v262_v42 }
 0x8b0   :  { %v290_v50 = vpack.c.bf16 %v728_v49, %v728_v49 }
 0x8b2   :  { %292 = vrot.lane.b32.xlu0 %v290_v50, %s664_s15 }
 0x924   :  { %v293_v51 = vpop.permute.xlu0 %292 }
 0x925   :  { %578 = vmatmul.msk.bf16.vlgmr.msrb.gmra.mxu0 %vm29_vm4, %v293_v51 }
 0x9a2   :  { %v306_v53 = vpop.f32.mrf.mxu0 }
 0x9a3   :  { %v310_v54 = vadd.f32 %v577_v52, %v306_v53 }
 0x9a5   :  { %630 = vtanh.f32 %v310_v54  ;;  %v579_v58 = vmul.f32 -1.442695, %v310_v54 }
 0x9a7   :  { %632 = vpow2.f32 %v579_v58 }
 0x9aa   :  { %v308_v55 = vpop.f32.mrf.mxu0 }
 0x9ab   :  { %v631_v57 = vpop.eup %630 }
 0x9ac   :  { %333 = vrot.lane.b32.xlu1 %v631_v57, %s663_s1 }
 0x9ad   :  { %v633_v59 = vpop.eup %632 }
 0x9ae   :  { %v314_v60 = vadd.f32 1.0, %v633_v59 }
 0x9b0   :  { %634 = vrcp.f32 %v314_v60  ;;  %v326_v2 = vand.u32 2147483648, %v314_v60  ;;  %vm320_vm2 = vweird.f32 %v314_v60  ;;  %v324_v3 = vand.u32 2147483647, %v314_v60 }
 0x9b2   :  { %v327_v5 = vor.u32 1.1754944e-38, %v326_v2  ;;  %vm325_vm5 = vcmp.eq.f32.partialorder %v324_v3, 8.507059e+37 }
 0x9b6   :  { %v635_v61 = vpop.eup %634 }
 0x9b7   :  { %v316_v62 = vmul.f32 %v635_v61, %v314_v60  ;;  %vm321_vm1 = vweird.f32 %v635_v61 }
 0x9b8   :  { %vm322_vm3 = vmor %vm320_vm2, %vm321_vm1  ;;  %vm88_vm1 = vcmask 254976  }
 0x9b9   :  { %v317_v63 = vsub.f32 1.0, %v316_v62 }
 0x9bb   :  { %v318_v0 = vmul.f32 %v635_v61, %v317_v63 }
 0x9bd   :  { %v319_v1 = vadd.f32 %v635_v61, %v318_v0 }
 0x9bf   :  { %v323_v4 = vsel %vm322_vm3, %v635_v61, %v319_v1 }
 0x9c0   :  { %v328_v7 = vsel %vm325_vm5, %v327_v5, %v323_v4 }
 0x9c1   :  { %v331_v9 = vmul.f32 %v328_v7, %v275_v46 }
 0xa1e   :  { %v334_v6 = vpop.permute.xlu1 %333 }
 0xa1f   :  { %v336_v8 = vmul.f32 %v334_v6, %v328_v7 }
 0xa21   :  { %338 = vrot.lane.b32.xlu2 %v336_v8, %s663_s1 }
 0xa7b   :  { %v339_v10 = vpop.permute.xlu2 %338 }
 0xa7c   :  { %v341_v11 = vadd.f32 %v339_v10, %v331_v9 }
 0xa7e   :  { %636 = vtanh.f32 %v341_v11 }
 0xa84   :  { %v637_v12 = vpop.eup %636 }
 0xa85   :  { %344 = vrot.lane.b32.xlu0 %v637_v12, %s663_s1 }
 0xaf7   :  { %v345_v13 = vpop.permute.xlu0 %344 }
 0xaf8   :  { %v740_v14 = vmul.f32 %v345_v13, %v328_v7  ;;  %v589_v13 = vld [vmem:[%s819_s0 + $0xe] sm:$0x3] }
 0xafa   :  { %v356_v15 = vpack.c.bf16 %v740_v14, %v740_v14 }
 0xafc   :  { %358 = vrot.lane.b32.xlu1 %v356_v15, %s664_s15 }
 0xb6e   :  { %v359_v16 = vpop.permute.xlu1 %358 }
 0xb6f   :  { %582 = vmatmul.msk.bf16.vlgmr.msrb.gmra.mxu1 %vm29_vm4, %v359_v16 }
 0xbec   :  { %v372_v18 = vpop.f32.mrf.mxu1 }
 0xbed   :  { %v376_v19 = vadd.f32 %v581_v17, %v372_v18 }
 0xbef   :  { %638 = vtanh.f32 %v376_v19  ;;  %v583_v23 = vmul.f32 -1.442695, %v376_v19 }
 0xbf1   :  { %640 = vpow2.f32 %v583_v23 }
 0xbf4   :  { %v374_v21 = vpop.f32.mrf.mxu1 }
 0xbf5   :  { %v639_v22 = vpop.eup %638 }
 0xbf6   :  { %399 = vrot.lane.b32.xlu2 %v639_v22, %s663_s1 }
 0xbf7   :  { %v641_v24 = vpop.eup %640 }
 0xbf8   :  { %v380_v25 = vadd.f32 1.0, %v641_v24 }
 0xbfa   :  { %642 = vrcp.f32 %v380_v25  ;;  %v392_v32 = vand.u32 2147483648, %v380_v25  ;;  %vm386_vm7 = vweird.f32 %v380_v25  ;;  %v390_v33 = vand.u32 2147483647, %v380_v25 }
 0xbfc   :  { %v393_v35 = vor.u32 1.1754944e-38, %v392_v32  ;;  %vm391_vm9 = vcmp.eq.f32.partialorder %v390_v33, 8.507059e+37 }
 0xc00   :  { %v643_v26 = vpop.eup %642 }
 0xc01   :  { %v382_v27 = vmul.f32 %v643_v26, %v380_v25  ;;  %vm387_vm6 = vweird.f32 %v643_v26 }
 0xc02   :  { %vm388_vm8 = vmor %vm386_vm7, %vm387_vm6 }
 0xc03   :  { %v383_v29 = vsub.f32 1.0, %v382_v27 }
 0xc05   :  { %v384_v30 = vmul.f32 %v643_v26, %v383_v29 }
 0xc07   :  { %v385_v31 = vadd.f32 %v643_v26, %v384_v30 }
 0xc09   :  { %v389_v34 = vsel %vm388_vm8, %v643_v26, %v385_v31 }
 0xc0a   :  { %v394_v37 = vsel %vm391_vm9, %v393_v35, %v389_v34 }
 0xc0b   :  { %v397_v39 = vmul.f32 %v394_v37, %v341_v11 }
 0xc50   :  { %v400_v36 = vpop.permute.xlu2 %399 }
 0xc51   :  { %v402_v38 = vmul.f32 %v400_v36, %v394_v37 }
 0xc53   :  { %404 = vrot.lane.b32.xlu0 %v402_v38, %s663_s1 }
 0xcc5   :  { %v405_v40 = vpop.permute.xlu0 %404 }
 0xcc6   :  { %v407_v41 = vadd.f32 %v405_v40, %v397_v39 }
 0xcc8   :  { %644 = vtanh.f32 %v407_v41 }
 0xcce   :  { %v645_v42 = vpop.eup %644 }
 0xccf   :  { %410 = vrot.lane.b32.xlu1 %v645_v42, %s663_s1 }
 0xd41   :  { %v411_v43 = vpop.permute.xlu1 %410 }
 0xd42   :  { %v752_v44 = vmul.f32 %v411_v43, %v394_v37 }
 0xd44   :  { %v422_v45 = vpack.c.bf16 %v752_v44, %v752_v44 }
 0xd46   :  { %424 = vrot.lane.b32.xlu2 %v422_v45, %s664_s15 }
 0xda0   :  { %v425_v46 = vpop.permute.xlu2 %424 }
 0xda1   :  { %586 = vmatmul.msk.bf16.vlgmr.msrb.gmra.mxu2 %vm29_vm4, %v425_v46 }
 0xe24   :  { %v438_v48 = vpop.f32.mrf.mxu2 }
 0xe25   :  { %v442_v50 = vadd.f32 %v585_v47, %v438_v48 }
 0xe27   :  { %646 = vtanh.f32 %v442_v50  ;;  %v587_v53 = vmul.f32 -1.442695, %v442_v50 }
 0xe29   :  { %648 = vpow2.f32 %v587_v53 }
 0xe2c   :  { %v440_v51 = vpop.f32.mrf.mxu2 }
 0xe2d   :  { %v647_v52 = vpop.eup %646 }
 0xe2e   :  { %465 = vrot.lane.b32.xlu0 %v647_v52, %s663_s1 }
 0xe2f   :  { %v649_v54 = vpop.eup %648 }
 0xe30   :  { %v446_v55 = vadd.f32 1.0, %v649_v54 }
 0xe32   :  { %650 = vrcp.f32 %v446_v55  ;;  %v458_v62 = vand.u32 2147483648, %v446_v55  ;;  %vm452_vm11 = vweird.f32 %v446_v55  ;;  %v456_v63 = vand.u32 2147483647, %v446_v55 }
 0xe34   :  { %v459_v1 = vor.u32 1.1754944e-38, %v458_v62  ;;  %vm457_vm13 = vcmp.eq.f32.partialorder %v456_v63, 8.507059e+37 }
 0xe38   :  { %v651_v57 = vpop.eup %650 }
 0xe39   :  { %v448_v58 = vmul.f32 %v651_v57, %v446_v55  ;;  %vm453_vm10 = vweird.f32 %v651_v57 }
 0xe3a   :  { %vm454_vm12 = vmor %vm452_vm11, %vm453_vm10 }
 0xe3b   :  { %v449_v59 = vsub.f32 1.0, %v448_v58 }
 0xe3d   :  { %v450_v60 = vmul.f32 %v651_v57, %v449_v59 }
 0xe3f   :  { %v451_v61 = vadd.f32 %v651_v57, %v450_v60 }
 0xe41   :  { %v455_v0 = vsel %vm454_vm12, %v651_v57, %v451_v61 }
 0xe42   :  { %v460_v3 = vsel %vm457_vm13, %v459_v1, %v455_v0 }
 0xe43   :  { %v463_v5 = vmul.f32 %v460_v3, %v407_v41 }
 0xea0   :  { %v466_v2 = vpop.permute.xlu0 %465 }
 0xea1   :  { %v468_v4 = vmul.f32 %v466_v2, %v460_v3 }
 0xea3   :  { %470 = vrot.lane.b32.xlu1 %v468_v4, %s663_s1 }
 0xf15   :  { %v471_v6 = vpop.permute.xlu1 %470 }
 0xf16   :  { %v473_v7 = vadd.f32 %v471_v6, %v463_v5 }
 0xf18   :  { %652 = vtanh.f32 %v473_v7 }
 0xf1e   :  { %v653_v8 = vpop.eup %652 }
 0xf1f   :  { %476 = vrot.lane.b32.xlu2 %v653_v8, %s663_s1 }
 0xf79   :  { %v477_v9 = vpop.permute.xlu2 %476 }
 0xf7a   :  { %v479_v10 = vmul.f32 %v477_v9, %v460_v3 }
 0xf7c   :  { %v488_v11 = vpack.c.bf16 %v479_v10, %v479_v10 }
 0xf7e   :  { %490 = vrot.lane.b32.xlu0 %v488_v11, %s664_s15 }
 0xff0   :  { %v491_v12 = vpop.permute.xlu0 %490 }
 0xff1   :  { %590 = vmatmul.msk.bf16.vlgmr.msrb.gmra.mxu3 %vm29_vm4, %v491_v12 }
0x1074   :  { %v504_v15 = vpop.f32.mrf.mxu3 }
0x1075   :  { %v508_v16 = vadd.f32 %v589_v13, %v504_v15 }
0x1077   :  { %654 = vtanh.f32 %v508_v16  ;;  %v591_v19 = vmul.f32 -1.442695, %v508_v16 }
0x1079   :  { %656 = vpow2.f32 %v591_v19 }
0x107c   :  { %v506_v17 = vpop.f32.mrf.mxu3 }
0x107d   :  { %v655_v18 = vpop.eup %654 }
0x107e   :  { %531 = vrot.lane.b32.xlu1 %v655_v18, %s663_s1 }
0x107f   :  { %v657_v21 = vpop.eup %656 }
0x1080   :  { %v512_v22 = vadd.f32 1.0, %v657_v21 }
0x1082   :  { %658 = vrcp.f32 %v512_v22  ;;  %v524_v29 = vand.u32 2147483648, %v512_v22  ;;  %vm518_vm14 = vweird.f32 %v512_v22  ;;  %v522_v30 = vand.u32 2147483647, %v512_v22 }
0x1084   :  { %v525_v31 = vor.u32 1.1754944e-38, %v524_v29  ;;  %vm523_vm0 = vcmp.eq.f32.partialorder %v522_v30, 8.507059e+37 }
0x1086   :  { %85 = vrot.lane.b32.xlu1 %v692_v28, %s664_s15 }
0x1088   :  { %v659_v23 = vpop.eup %658 }
0x1089   :  { %v514_v24 = vmul.f32 %v659_v23, %v512_v22  ;;  %vm519_vm4 = vweird.f32 %v659_v23 }
0x108a   :  { %vm520_vm15 = vmor %vm518_vm14, %vm519_vm4 }
0x108b   :  { %v515_v25 = vsub.f32 1.0, %v514_v24 }
0x108d   :  { %v516_v26 = vmul.f32 %v659_v23, %v515_v25 }
0x108e   :  { %283 = vrot.lane.b32.xlu1 %v728_v49, %s664_s15 }
0x108f   :  { %v517_v27 = vadd.f32 %v659_v23, %v516_v26 }
0x1091   :  { %v521_v28 = vsel %vm520_vm15, %v659_v23, %v517_v27 }
0x1092   :  { %v526_v32 = vsel %vm523_vm0, %v525_v31, %v521_v28 }
0x1093   :  { %v529_v37 = vmul.f32 %v526_v32, %v473_v7 }
0x1096   :  { %481 = vrot.lane.b32.xlu1 %v479_v10, %s664_s15 }
0x10f0   :  { %v532_v49 = vpop.permute.xlu1 %531 }
0x10f1   :  { %v534_v33 = vmul.f32 %v532_v49, %v526_v32 }
0x10f3   :  { %536 = vrot.lane.b32.xlu2 %v534_v33, %s663_s1 }
0x10f8   :  { %v86_v34 = vpop.permute.xlu1 %85 }
0x10f9   :  { %89 = vst.msk [vmem:[%s820_s2] sm:$0x3] %vm88_vm1, %v86_v34 }
0x10fb   :  { %151 = vrot.lane.b32.xlu2 %v704_v56, %s664_s15 }
0x1100   :  { %v284_v35 = vpop.permute.xlu1 %283 }
0x1101   :  { %576 = vst.msk [vmem:[%s820_s2 + $0x6] sm:$0x3] %vm88_vm1, %v284_v35 }
0x1103   :  { %349 = vrot.lane.b32.xlu2 %v740_v14, %s664_s15 }
0x1108   :  { %v482_v36 = vpop.permute.xlu1 %481 }
0x1109   :  { %588 = vst.msk [vmem:[%s820_s2 + $0xc] sm:$0x3] %vm88_vm1, %v482_v36 }
0x114d   :  { %v537_v38 = vpop.permute.xlu2 %536 }
0x114e   :  { %v539_v39 = vadd.f32 %v537_v38, %v529_v37 }
0x1150   :  { %660 = vtanh.f32 %v539_v39 }
0x1155   :  { %v152_v56 = vpop.permute.xlu2 %151 }
0x1156   :  { %v661_v40 = vpop.eup %660  ;;  %568 = vst.msk [vmem:[%s820_s2 + $0x2] sm:$0x3] %vm88_vm1, %v152_v56 }
0x1157   :  { %542 = vrot.lane.b32.xlu0 %v661_v40, %s663_s1 }
0x115d   :  { %v350_v14 = vpop.permute.xlu2 %349 }
0x115e   :  { %580 = vst.msk [vmem:[%s820_s2 + $0x8] sm:$0x3] %vm88_vm1, %v350_v14 }
0x115f   :  { %217 = vrot.lane.b32.xlu0 %v716_v20, %s664_s15 }
0x1167   :  { %415 = vrot.lane.b32.xlu0 %v752_v44, %s664_s15 }
0x11c9   :  { %v543_v41 = vpop.permute.xlu0 %542 }
0x11ca   :  { %v545_v42 = vmul.f32 %v543_v41, %v526_v32 }
0x11cc   :  { %547 = vrot.lane.b32.xlu2 %v545_v42, %s664_s15 }
0x11d1   :  { %v218_v43 = vpop.permute.xlu0 %217 }
0x11d2   :  { %572 = vst.msk [vmem:[%s820_s2 + $0x4] sm:$0x3] %vm88_vm1, %v218_v43 }
0x11d9   :  { %v416_v45 = vpop.permute.xlu0 %415 }
0x11da   :  { %584 = vst.msk [vmem:[%s820_s2 + $0xa] sm:$0x3] %vm88_vm1, %v416_v45 }
0x1226   :  { %v548_v20 = vpop.permute.xlu2 %547 }
0x1227   :  { %592 = vst.msk [vmem:[%s820_s2 + $0xe] sm:$0x3] %vm88_vm1, %v548_v20 }

// kernel: man_forward.3
= control target key start
LH: loop header
LB: loop body
LE: loop exit
PB: predicated region body
PF: predicated region fallthrough
CT: control target
= control target key end

     0   :  { %s951_s15 = smov 0   ;;  %s1036_s0 = inlined_call_operand.vmem [shape: f32[2,8,32], index: 0, kind: input, shape index: {}]   ;;  %s1037_s1 = inlined_call_operand.vmem [shape: bf16[32,128], index: 1, kind: input, shape index: {}]   ;;  %s1038_s2 = inlined_call_operand.vmem [shape: f32[4,1,1], index: 2, kind: input, shape index: {}]   ;;  %s1039_s3 = inlined_call_operand.vmem [shape: f32[2,2,8,8], index: 3, kind: output, shape index: {0}]   ;;  %s1040_s4 = inlined_call_operand.vmem [shape: f32[2,1,1], index: 4, kind: output, shape index: {1}]  }
   0x1 LB: > { %s835_s16 = sadd.s32 4294967295, %s919_s15   ;;  %p839_p0 = scmp.ge.s32.totalorder %s919_s15, 1  ;;  %s919_s15 = sphi %s951_s15, %s15_s15  }
   0x2   : > { %p164_p1 = scmp.lt.s32.totalorder %s919_s15, 3 }
   0x4   : > { %p165_p2 = pnand %p839_p0, %p164_p1 }
   0x5   : > { %p192_p3 = scmp.lt.s32.totalorder (!%p165_p2), %s835_s16, 1  ;;  %s921_s25 = smov (!%p165_p2), 64  }
   0x6   : > { %168 = sbr.rel (%p165_p2) target bundleno = 1434 (0x59a), region = 32  ;;  %s922_s26 = smov (!%p165_p2), 96  }
   0x7   : > { %s923_s27 = smov (!%p165_p2), 32  }
   0xb   : > { %v866_v0 = vld [vmem:[%s1037_s1 + $0x8] sm:$0xff]  ;;  %v865_v1 = vld [vmem:[%s1037_s1] sm:$0xff]  ;;  %s1042_s16 = smov (!%p192_p3, %s835_s16), 1  ;;  %vm261_vm0 = vcmask 261120   ;;  %v924_v9 = vmov 0   ;;  %vm309_vm1 = vcmask 64512  }
   0xc   : > { %271 = vmatpush.bf16.msra.mxu0 %v866_v0  ;;  %s840_s21 = sshll.u32 %s1042_s16, 3  ;;  %882 = vset.pattern.permute.xlu1 %v924_v9  ;;  %v885_v10 = vld [vmem:[%s1038_s2 + $0x1] ss:$0 sm:$0xff]  ;;  %v886_v12 = vld [vmem:[%s1038_s2] ss:$0 sm:$0xff]  ;;  %s864_s8 = sshll.u32 %s1042_s16, 4 }
   0xd   : > { %s195_s24 = scalar_lea.vmem %s1036_s0, %s840_s21  ;;  %346 = vperm.xlu1 %882, %v885_v10   ;;  %v887_v14 = vld [vmem:[%s1038_s2 + $0x3] ss:$0 sm:$0xff]  ;;  %s200_s11 = scalar_lea.vmem %s1039_s3, %s864_s8 }
   0xe   : > { %v205_v2 = vld [vmem:[%s195_s24] sm:$0xff]  ;;  %s203_s18 = scalar_lea.vmem %s1040_s4, %s1042_s16 }
   0xf   : > { %v206_v3 = vpack.c.bf16 %v205_v2, %v205_v2 }
  0x10   : > { %272 = vmatpush.bf16.msra.mxu0 %v865_v1 }
  0x13   : > { %851 = vmatmul.msk.bf16.vlgmr.msra.gmra.mxu0 %vm261_vm0, %v206_v3 }
  0x15   : > { %289 = vperm.xlu1 %882, %v886_v12  }
  0x7f   : > { %v347_v20 = vpop.permute.xlu1 %346 }
  0x87   : > { %v290_v21 = vpop.permute.xlu1 %289 }
  0x90   : > { %v274_v4 = vpop.f32.mrf.mxu0 }
  0x91   : > { %v285_v5 = vpack.c.bf16 %v274_v4, %v274_v4 }
  0x93   : > { %519 = vrot.lane.b32.xlu2 %v285_v5, %s921_s25  ;;  %350 = vrot.lane.b32.xlu0 %v285_v5, %s922_s26 }
  0x98   : > { %v276_v6 = vpop.f32.mrf.mxu0 }
  0x9b   : > { %632 = vrot.lane.b32.xlu2 %v285_v5, %s923_s27 }
  0xb5   : > { %207 = vxpose.xlu0.b32.start.end [1/1] (short) (narrow) %v205_v2, 32 }
  0xed   : > { %v995_v18 = vpop.permute.xlu2 %519 }
  0xf5   : > { %v633_v19 = vpop.permute.xlu2 %632 }
 0x105   : > { %v351_v7 = vpop.permute.xlu0 %350 }
 0x11c   : > { %883 = vset.pattern.permute.xlu0 %v924_v9 }
 0x13b   : > { %629 = vperm.xlu0 %883, %v887_v14  }
 0x159   : > { %v223_v8 = vpop.trf.xlu0 }
 0x161   : > { %v224_v11 = vpop.trf.xlu0 }
 0x162   : > { %v987_v17 = vpack.c.bf16 %v224_v11, %v223_v8 }
 0x169   : > { %v225_v13 = vpop.trf.xlu0 }
 0x171   : > { %v226_v15 = vpop.trf.xlu0 }
 0x172   : > { %v983_v16 = vpack.c.bf16 %v226_v15, %v225_v13 }
 0x174   : > { %301 = vmatpush.bf16.msra.mxu1 %v983_v16  ;;  %361 = vmatpush.bf16.msra.mxu2 %v983_v16 }
 0x178   : > { %302 = vmatpush.bf16.msra.mxu1 %v987_v17  ;;  %362 = vmatpush.bf16.msra.mxu2 %v987_v17 }
 0x17b   : > { %853 = vmatmul.msk.bf16.vlgmr.msra.gmra.mxu1 %vm261_vm0, %v285_v5  ;;  %854 = vmatmul.msk.bf16.vlgmr.msra.gmra.mxu2 %vm261_vm0, %v351_v7 }
 0x17c   : > { %643 = vmatpush.bf16.msrb.mxu1 %v983_v16 }
 0x180   : > { %644 = vmatpush.bf16.msrb.mxu1 %v987_v17 }
 0x18b   : > { %860 = vmatmul.msk.bf16.vlgmr.msrb.gmra.mxu1 %vm261_vm0, %v633_v19 }
 0x1ad   : > { %v630_v32 = vpop.permute.xlu0 %629 }
 0x1f8   : > { %v304_v22 = vpop.f32.mrf.mxu1 }
 0x1f9   : > { %v305_v23 = vadd.f32 %v304_v22, %v290_v21 }
 0x1fb   : > { %889 = vtanh.f32 %v305_v23 }
 0x1fe   : > { %v364_v24 = vpop.f32.mrf.mxu2 }
 0x1ff   : > { %v365_v25 = vadd.f32 %v364_v24, %v347_v20 }
 0x200   : > { %v306_v26 = vpop.f32.mrf.mxu1 }
 0x201   : > { %v890_v27 = vpop.eup %889  ;;  %891 = vtanh.f32 %v365_v25 }
 0x202   : > { %v310_v28 = vsel %vm309_vm1, %v890_v27, -inf }
 0x203   : > { %v311_v29 = vrot.slane %v310_v28, 4 }
 0x205   : > { %v312_v30 = vmax.f32 %v310_v28, %v311_v29 }
 0x206   : > { %v366_v31 = vpop.f32.mrf.mxu2 }
 0x207   : > { %v892_v33 = vpop.eup %891  ;;  %v313_v34 = vrot.slane %v312_v30, 2 }
 0x208   : > { %v369_v35 = vsel %vm309_vm1, %v892_v33, -inf  ;;  %v646_v36 = vpop.f32.mrf.mxu1 }
 0x209   : > { %v314_v37 = vmax.f32 %v312_v30, %v313_v34  ;;  %v370_v38 = vrot.slane %v369_v35, 4  ;;  %v647_v39 = vadd.f32 %v646_v36, %v630_v32 }
 0x20b   : > { %v315_v40 = vrot.slane %v314_v37, 1  ;;  %v371_v41 = vmax.f32 %v369_v35, %v370_v38  ;;  %893 = vtanh.f32 %v647_v39 }
 0x20d   : > { %v316_v42 = vmax.f32 %v314_v37, %v315_v40  ;;  %v372_v43 = vrot.slane %v371_v41, 2 }
 0x20f   : > { %v317_v44 = vsub.f32 %v890_v27, %v316_v42  ;;  %v373_v45 = vmax.f32 %v371_v41, %v372_v43 }
 0x210   : > { %v648_v46 = vpop.f32.mrf.mxu1 }
 0x211   : > { %v894_v47 = vpop.eup %893  ;;  %v318_v48 = vmul.f32 1.442695, %v317_v44  ;;  %v374_v49 = vrot.slane %v373_v45, 1 }
 0x212   : > { %v651_v50 = vsel %vm309_vm1, %v894_v47, -inf }
 0x213   : > { %895 = vpow2.f32 %v318_v48  ;;  %v375_v51 = vmax.f32 %v373_v45, %v374_v49  ;;  %v652_v52 = vrot.slane %v651_v50, 4 }
 0x215   : > { %v376_v53 = vsub.f32 %v892_v33, %v375_v51  ;;  %v653_v54 = vmax.f32 %v651_v50, %v652_v52 }
 0x217   : > { %v377_v55 = vmul.f32 1.442695, %v376_v53  ;;  %v654_v56 = vrot.slane %v653_v54, 2 }
 0x219   : > { %v896_v57 = vpop.eup %895  ;;  %897 = vpow2.f32 %v377_v55  ;;  %v655_v58 = vmax.f32 %v653_v54, %v654_v56 }
 0x21a   : > { %v320_v59 = vsel %vm309_vm1, %v896_v57, 0.0 }
 0x21b   : > { %v321_v60 = vrot.slane %v320_v59, 4  ;;  %v656_v61 = vrot.slane %v655_v58, 1 }
 0x21d   : > { %v322_v62 = vadd.f32 %v321_v60, %v320_v59  ;;  %v657_v63 = vmax.f32 %v655_v58, %v656_v61  ;;  %v888_v59 = vld [vmem:[%s1038_s2 + $0x2] ss:$0 sm:$0xff] }
 0x21f   : > { %v898_v0 = vpop.eup %897  ;;  %v323_v1 = vrot.slane %v322_v62, 2  ;;  %v658_v2 = vsub.f32 %v894_v47, %v657_v63 }
 0x220   : > { %v379_v3 = vsel %vm309_vm1, %v898_v0, 0.0 }
 0x221   : > { %v324_v4 = vadd.f32 %v323_v1, %v322_v62  ;;  %v380_v5 = vrot.slane %v379_v3, 4  ;;  %v659_v6 = vmul.f32 1.442695, %v658_v2 }
 0x223   : > { %v325_v7 = vrot.slane %v324_v4, 1  ;;  %v381_v8 = vadd.f32 %v380_v5, %v379_v3  ;;  %899 = vpow2.f32 %v659_v6 }
 0x225   : > { %v382_v10 = vrot.slane %v381_v8, 2  ;;  %v326_v11 = vadd.f32 %v325_v7, %v324_v4 }
 0x227   : > { %v383_v12 = vadd.f32 %v382_v10, %v381_v8  ;;  %901 = vrcp.f32 %v326_v11  ;;  %v338_v27 = vand.u32 2147483648, %v326_v11  ;;  %v336_v29 = vand.u32 2147483647, %v326_v11 }
 0x228   : > { %vm332_vm3 = vweird.f32 %v326_v11 }
 0x229   : > { %v1003_v13 = vpop.eup %899  ;;  %v384_v14 = vrot.slane %v383_v12, 1  ;;  %v339_v34 = vor.u32 1.1754944e-38, %v338_v27  ;;  %vm337_vm5 = vcmp.eq.f32.partialorder %v336_v29, 8.507059e+37 }
 0x22a   : > { %v661_v15 = vsel %vm309_vm1, %v1003_v13, 0.0 }
 0x22b   : > { %v662_v19 = vrot.slane %v661_v15, 4  ;;  %v385_v20 = vadd.f32 %v384_v14, %v383_v12 }
 0x22d   : > { %v902_v21 = vpop.eup %901  ;;  %v663_v22 = vadd.f32 %v662_v19, %v661_v15  ;;  %903 = vrcp.f32 %v385_v20  ;;  %v397_v39 = vand.u32 2147483648, %v385_v20  ;;  %v395_v42 = vand.u32 2147483647, %v385_v20 }
 0x22e   : > { %v328_v23 = vmul.f32 %v902_v21, %v326_v11  ;;  %vm333_vm2 = vweird.f32 %v902_v21  ;;  %vm391_vm7 = vweird.f32 %v385_v20 }
 0x22f   : > { %v664_v24 = vrot.slane %v663_v22, 2  ;;  %vm334_vm4 = vmor %vm332_vm3, %vm333_vm2  ;;  %v398_v44 = vor.u32 1.1754944e-38, %v397_v39  ;;  %vm396_vm9 = vcmp.eq.f32.partialorder %v395_v42, 8.507059e+37  ;;  %v925_v42 = vmov 0.0  }
 0x230   : > { %v329_v25 = vsub.f32 1.0, %v328_v23 }
 0x231   : > { %v665_v26 = vadd.f32 %v664_v24, %v663_v22 }
 0x232   : > { %v330_v28 = vmul.f32 %v902_v21, %v329_v25 }
 0x233   : > { %v904_v30 = vpop.eup %903  ;;  %v666_v31 = vrot.slane %v665_v26, 1 }
 0x234   : > { %v331_v32 = vadd.f32 %v902_v21, %v330_v28  ;;  %v387_v33 = vmul.f32 %v904_v30, %v385_v20  ;;  %vm392_vm6 = vweird.f32 %v904_v30 }
 0x235   : > { %v667_v35 = vadd.f32 %v666_v31, %v665_v26  ;;  %vm393_vm8 = vmor %vm391_vm7, %vm392_vm6 }
 0x236   : > { %v335_v36 = vsel %vm334_vm4, %v902_v21, %v331_v32  ;;  %v388_v37 = vsub.f32 1.0, %v387_v33  ;;  %vm753_vm4 = vcmask 0  }
 0x237   : > { %v340_v38 = vsel %vm337_vm5, %v339_v34, %v335_v36  ;;  %905 = vrcp.f32 %v667_v35  ;;  %v679_v51 = vand.u32 2147483648, %v667_v35  ;;  %v677_v53 = vand.u32 2147483647, %v667_v35 }
 0x238   : > { %v341_v40 = vmul.f32 %v896_v57, %v340_v38  ;;  %v389_v41 = vmul.f32 %v904_v30, %v388_v37  ;;  %vm673_vm11 = vweird.f32 %v667_v35  ;;  %v278_v36 = vlaneseq }
 0x239   : > { %v680_v55 = vor.u32 1.1754944e-38, %v679_v51  ;;  %vm678_vm13 = vcmp.eq.f32.partialorder %v677_v53, 8.507059e+37 }
 0x23a   : > { %458 = vxpose.xlu2.b32.start.end [1/1] (short) (narrow) %v341_v40, 8  ;;  %342 = vst.msk [vmem:[%s200_s11] sm:$0xff] %vm309_vm1, %v341_v40  ;;  %v390_v43 = vadd.f32 %v904_v30, %v389_v41  ;;  %v279_v37 = vshrl.u32 %v278_v36, 7  ;;  %v281_v38 = vand.u32 127, %v278_v36 }
 0x23c   : > { %v394_v45 = vsel %vm393_vm8, %v904_v30, %v390_v43  ;;  %vm282_vm3 = vcmp.eq.s32.totalorder %v279_v37, %v281_v38 }
 0x23d   : > { %v906_v46 = vpop.eup %905  ;;  %v399_v47 = vsel %vm396_vm9, %v398_v44, %v394_v45  ;;  %v852_v43 = vsel %vm282_vm3, 1.0, %v925_v42 }
 0x23e   : > { %v400_v48 = vmul.f32 %v898_v0, %v399_v47  ;;  %v669_v49 = vmul.f32 %v906_v46, %v667_v35  ;;  %vm674_vm10 = vweird.f32 %v906_v46 }
 0x23f   : > { %vm675_vm12 = vmor %vm673_vm11, %vm674_vm10 }
 0x240   : > { %403 = vxpose.xlu1.b32.start.end [1/1] (short) (narrow) %v400_v48, 8  ;;  %855 = vst.msk [vmem:[%s200_s11 + $0x8] sm:$0xff] %vm309_vm1, %v400_v48  ;;  %453 = vmatpush.msra.mxu3 %v400_v48  ;;  %v670_v50 = vsub.f32 1.0, %v669_v49 }
 0x242   : > { %508 = vmatpush.msrb.mxu3 %v341_v40  ;;  %v671_v52 = vmul.f32 %v906_v46, %v670_v50 }
 0x244   : > { %v672_v54 = vadd.f32 %v906_v46, %v671_v52 }
 0x246   : > { %v676_v56 = vsel %vm675_vm12, %v906_v46, %v672_v54 }
 0x247   : > { %v681_v57 = vsel %vm678_vm13, %v680_v55, %v676_v56 }
 0x248   : > { %v682_v58 = vmul.f32 %v1003_v13, %v681_v57 }
 0x24a   : > { %683 = vxpose.xlu1.b32.start.end [1/1] (short) (narrow) %v682_v58, 8  ;;  %733 = vmatpush.msrb.mxu2 %v682_v58 }
 0x29c   : > { %884 = vset.pattern.permute.xlu2 %v924_v9 }
 0x2a3   : > { %516 = vperm.xlu2 %884, %v888_v59  }
 0x2d3   : > { %v474_v61 = vpop.trf.xlu2 }
 0x2e4   : > { %v419_v60 = vpop.trf.xlu1 }
 0x2e5   : > { %856 = vmatmul.msk.f32.vlgmr.msra.gmra.mxu3 %vm309_vm1, %v419_v60 }
 0x2e6   : > { %530 = vmatpush.bf16.msra.mxu3 %v983_v16 }
 0x2ea   : > { %531 = vmatpush.bf16.msra.mxu3 %v987_v17 }
 0x2ed   : > { %857 = vmatmul.msk.f32.vlgmr.msrb.gmra.mxu3 %vm309_vm1, %v474_v61 }
 0x2ee   : > { %v699_v14 = vpop.trf.xlu1 }
 0x2ef   : > { %861 = vmatmul.msk.f32.vlgmr.msrb.gmra.mxu2 %vm309_vm1, %v699_v14 }
 0x2f5   : > { %858 = vmatmul.msk.bf16.vlgmr.msra.gmra.mxu3 %vm261_vm0, %v995_v18 }
 0x2fd   : > { %v517_v0 = vpop.permute.xlu2 %516 }
 0x368   : > { %v455_v62 = vpop.f32.mrf.mxu3 }
 0x370   : > { %v510_v9 = vpop.f32.mrf.mxu3 }
 0x371   : > { %v511_v63 = vadd.f32 %v510_v9, %v455_v62 }
 0x372   : > { %v735_v41 = vpop.f32.mrf.mxu2 }
 0x378   : > { %v533_v1 = vpop.f32.mrf.mxu3 }
 0x379   : > { %v534_v2 = vadd.f32 %v533_v1, %v517_v0 }
 0x37b   : > { %907 = vtanh.f32 %v534_v2 }
 0x380   : > { %v535_v3 = vpop.f32.mrf.mxu3 }
 0x381   : > { %v908_v4 = vpop.eup %907 }
 0x382   : > { %v538_v5 = vsel %vm309_vm1, %v908_v4, -inf }
 0x383   : > { %v539_v16 = vrot.slane %v538_v5, 4 }
 0x385   : > { %v540_v6 = vmax.f32 %v538_v5, %v539_v16 }
 0x387   : > { %v541_v17 = vrot.slane %v540_v6, 2 }
 0x389   : > { %v542_v7 = vmax.f32 %v540_v6, %v541_v17 }
 0x38b   : > { %v543_v8 = vrot.slane %v542_v7, 1 }
 0x38d   : > { %v544_v10 = vmax.f32 %v542_v7, %v543_v8 }
 0x38f   : > { %v545_v11 = vsub.f32 %v908_v4, %v544_v10 }
 0x391   : > { %v546_v12 = vmul.f32 1.442695, %v545_v11 }
 0x393   : > { %909 = vpow2.f32 %v546_v12 }
 0x399   : > { %v910_v18 = vpop.eup %909 }
 0x39a   : > { %v548_v13 = vsel %vm309_vm1, %v910_v18, 0.0 }
 0x39b   : > { %v549_v15 = vrot.slane %v548_v13, 4 }
 0x39d   : > { %v550_v19 = vadd.f32 %v549_v15, %v548_v13 }
 0x39f   : > { %v551_v20 = vrot.slane %v550_v19, 2 }
 0x3a1   : > { %v552_v21 = vadd.f32 %v551_v20, %v550_v19 }
 0x3a3   : > { %v553_v22 = vrot.slane %v552_v21, 1 }
 0x3a5   : > { %v554_v23 = vadd.f32 %v553_v22, %v552_v21 }
 0x3a7   : > { %911 = vrcp.f32 %v554_v23  ;;  %v566_v27 = vand.u32 2147483648, %v554_v23  ;;  %v564_v29 = vand.u32 2147483647, %v554_v23  ;;  %vm560_vm15 = vweird.f32 %v554_v23 }
 0x3a9   : > { %v567_v31 = vor.u32 1.1754944e-38, %v566_v27  ;;  %vm565_vm2 = vcmp.eq.f32.partialorder %v564_v29, 8.507059e+37 }
 0x3ad   : > { %v912_v24 = vpop.eup %911 }
 0x3ae   : > { %v556_v25 = vmul.f32 %v912_v24, %v554_v23  ;;  %vm561_vm14 = vweird.f32 %v912_v24 }
 0x3af   : > { %vm562_vm0 = vmor %vm560_vm15, %vm561_vm14 }
 0x3b0   : > { %v557_v26 = vsub.f32 1.0, %v556_v25 }
 0x3b2   : > { %v558_v28 = vmul.f32 %v912_v24, %v557_v26 }
 0x3b4   : > { %v559_v30 = vadd.f32 %v912_v24, %v558_v28 }
 0x3b6   : > { %v563_v32 = vsel %vm562_vm0, %v912_v24, %v559_v30 }
 0x3b7   : > { %v568_v33 = vsel %vm565_vm2, %v567_v31, %v563_v32 }
 0x3b8   : > { %v569_v34 = vmul.f32 %v910_v18, %v568_v33 }
 0x3ba   : > { %620 = vmatpush.msrb.mxu0 %v569_v34  ;;  %570 = vxpose.xlu1.b32.start.end [1/1] (short) (narrow) %v569_v34, 8 }
 0x45e   : > { %v586_v35 = vpop.trf.xlu1 }
 0x45f   : > { %859 = vmatmul.msk.f32.vlgmr.msrb.gmra.mxu0 %vm309_vm1, %v586_v35 }
 0x4dc   : > { %v622_v39 = vpop.f32.mrf.mxu0 }
 0x4dd   : > { %v625_v40 = vadd.f32 %v622_v39, %v511_v63 }
 0x4df   : > { %v738_v44 = vadd.f32 %v735_v41, %v625_v40 }
 0x4e1   : > { %v739_v45 = vsub.f32 %v738_v44, %v852_v43 }
 0x4e3   : > { %v740_v46 = vmul.f32 %v739_v45, %v739_v45 }
 0x4e5   : > { %v741_v47 = vsel %vm309_vm1, %v740_v46, 0.0 }
 0x4e6   : > { %742 = vadd.xlane.f32.xlu1 %v741_v47 }
 0x559   : > { %v743_v48 = vpop.xlane.xlu1 %742 }
 0x55a   : > { %v744_v49 = vrot.slane %v743_v48, 4 }
 0x55c   : > { %v745_v50 = vadd.f32 %v744_v49, %v743_v48 }
 0x55e   : > { %v746_v51 = vrot.slane %v745_v50, 2 }
 0x560   : > { %v747_v52 = vadd.f32 %v746_v51, %v745_v50 }
 0x562   : > { %v748_v53 = vrot.slane %v747_v52, 1 }
 0x564   : > { %v749_v54 = vadd.f32 %v748_v53, %v747_v52 }
 0x566   : > { %867 = vpush %v749_v54 }
 0x597   : > { %s868_s19 = spop %867 }
 0x598   : > { %v751_v55 = vstv %s868_s19 }
 0x599   : > { %754 = vst.msk [vmem:[%s203_s18] sm:$0x1] %vm753_vm4, %v751_v55 }
 0x59a PF: > { %s15_s15 = sadd.s32 1, %s919_s15  }
 0x59b   : > { %p12_p4 = scmp.ge.s32.totalorder %s15_s15, 4  }
 0x59d   :  { %14 = sbr.rel (!%p12_p4) target bundleno = 1 (0x1), region = 75 }

</bundles_post_ra>
